<compile_context>
chip_gen: v7x
topology: tpu7x:2x2x1
jax: 0.10.0
libtpu: 0.0.40
codegen_flags: <defaults>
</compile_context>

<pallas_src>
import jax
import jax.numpy as jnp
from jax.experimental import pallas as pl
from jax.experimental.pallas import tpu as pltpu


def _choose_hw_tiling(hw, batch, channels, itemsize,
                      block_bytes_budget=1 << 20, min_programs=2):
    """Pick (hw_pad, ts, n_hw) for lane/sublane-dense (channels, ts, 128) blocks.

    - ts (sublane rows per tile) targets ~block_bytes_budget bytes per streamed
      block so the ~0.35us per-grid-step overhead is amortised while the
      double-buffered (3 in + 1 out) working set stays well inside v7x's VMEM.
    - hw is padded up to ts * n_hw * 128 so stores are always unmasked.
    - if `batch` alone yields fewer than `min_programs` grid programs, the HW
      axis is split so v7x's two TensorCores both get work.
    """
    n_rows = -(-hw // 128)                                   # ceil(hw / 128)
    budget_rows = max(8, (block_bytes_budget // (channels * 128 * itemsize)) // 8 * 8)
    want_split = batch < min_programs and n_rows >= 16
    if n_rows <= budget_rows and not want_split:
        ts, n_hw = n_rows, 1                                 # full extent (legal even if < 8)
    else:
        ts = n_rows // 2 if (want_split and n_rows // 2 < budget_rows) else budget_rows
        ts = max(8, (ts // 8) * 8)                           # sublane-dense tiles
        n_hw = -(-n_rows // ts)
    return ts * n_hw * 128, ts, n_hw


# ---------------------------------------------------------------------------
# Fused kernel: one (batch, HW-tile) step.
# Blocks are (1, C, TS, 128); weights / per-batch coefficients live in SMEM.
# ---------------------------------------------------------------------------
def fused_cfg_kernel(coef_ref, ctx_ref, wz_ref, wc_ref,
                     z_ref, ccc_ref, ucc_ref, out_ref):
    b = pl.program_id(0)
    a_z = coef_ref[0, b]          # c_in
    a_c = coef_ref[1, b]          # c_in * image_cfg_scale
    a_u = coef_ref[2, b]          # c_in * (1 - image_cfg_scale)

    C = out_ref.shape[1]
    # Unrolled VPU broadcast-FMA channel mix (C == 4): per output channel,
    # accumulate scalar-weighted (TS, 128) planes of z / cond cc / uncond cc,
    # then add the precomputed CFG conditioning bias.
    for co in range(C):
        acc = (a_z * wz_ref[0, co]) * z_ref[0, 0]
        for k in range(1, C):
            acc = acc + (a_z * wz_ref[k, co]) * z_ref[0, k]
        for k in range(C):
            acc = acc + (a_c * wc_ref[k, co]) * ccc_ref[0, k]
            acc = acc + (a_u * wc_ref[k, co]) * ucc_ref[0, k]
        out_ref[0, co] = (acc + ctx_ref[b, co]).astype(out_ref.dtype)


# ---------------------------------------------------------------------------
# Wrapper: exact semantics of CFGDenoiser.forward (NCHW in, NCHW out, dtype of z).
# ---------------------------------------------------------------------------
def cfg_denoiser_forward(z, sigma, cond, uncond,
                         text_cfg_scale, image_cfg_scale, params):
    B, C, H, W = z.shape
    HW = H * W
    out_dtype = z.dtype
    itemsize = jnp.dtype(out_dtype).itemsize

    cond_ca = cond["c_crossattn"][0]
    uncond_ca = uncond["c_crossattn"][0]
    cond_cc = cond["c_concat"][0]
    uncond_cc = uncond["c_concat"][0]

    # Per-batch input scale of the (surrogate) inner model.
    sigma_f = sigma.astype(jnp.float32)
    c_in = 1.0 / jnp.sqrt(sigma_f * sigma_f + 1.0)                        # (B,)

    # Cross-attn pooling hoisted out of the streaming loop (tiny (B,S,D)@(D,C)).
    wt = params["wt"].astype(jnp.float32)
    ctx_c = jnp.mean(cond_ca.astype(jnp.float32) @ wt, axis=1)            # (B, C)
    ctx_u = jnp.mean(uncond_ca.astype(jnp.float32) @ wt, axis=1)          # (B, C)
    # CFG-folded conditioning bias (linearity of the surrogate inner model).
    ctx_bias = (c_in[:, None]
                * (ctx_u + text_cfg_scale * (ctx_c - ctx_u))).astype(jnp.float32)

    # Per-batch blend coefficients for the channel-mix terms.
    coef = jnp.stack([c_in,
                      c_in * image_cfg_scale,
                      c_in * (1.0 - image_cfg_scale)], axis=0).astype(jnp.float32)

    wz = params["wz"].astype(jnp.float32)                                 # (C, C)
    wc = params["wc"].astype(jnp.float32)                                 # (C, C)

    # Sublane/lane-dense tiling of the HW axis.
    hw_pad, TS, n_hw = _choose_hw_tiling(HW, B, C, itemsize)
    NR = hw_pad // 128

    def to_tiles(x):
        xf = x.reshape(B, C, HW)
        if hw_pad != HW:
            xf = jnp.pad(xf, ((0, 0), (0, 0), (0, hw_pad - HW)))
        return xf.reshape(B, C, NR, 128)

    z_t = to_tiles(z)
    ccc_t = to_tiles(cond_cc.astype(out_dtype))
    ucc_t = to_tiles(uncond_cc.astype(out_dtype))

    cost = pl.CostEstimate(
        flops=int(B * C * hw_pad * (6 * C + 1)),
        transcendentals=0,
        bytes_accessed=int(4 * B * C * hw_pad * itemsize))

    blk = pl.BlockSpec((1, C, TS, 128), lambda b, h: (b, 0, h, 0))
    smem = pl.BlockSpec(memory_space=pltpu.MemorySpace.SMEM)

    out = pl.pallas_call(
        fused_cfg_kernel,
        out_shape=jax.ShapeDtypeStruct((B, C, NR, 128), out_dtype),
        grid=(B, n_hw),
        in_specs=[
            smem,    # coef     (3, B)
            smem,    # ctx_bias (B, C)
            smem,    # wz       (C, C)
            smem,    # wc       (C, C)
            blk,     # z
            blk,     # cond   c_concat
            blk,     # uncond c_concat
        ],
        out_specs=blk,
        compiler_params=pltpu.CompilerParams(
            dimension_semantics=("parallel", "parallel"),
            vmem_limit_bytes=32 * 1024 * 1024),
        cost_estimate=cost,
    )(coef, ctx_bias, wz, wc, z_t, ccc_t, ucc_t)

    out = out.reshape(B, C, hw_pad)[..., :HW].reshape(B, C, H, W)
    return out


# ---------------------------------------------------------------------------
# Pure-JAX reference mirroring the original module structure (3x batch concat,
# inner model on all branches, chunk(3), CFG combine) for correctness checking.
# ---------------------------------------------------------------------------
def _reference(z, sigma, cond, uncond, t_scale, i_scale, params):
    def inner(zz, sg, ca, cc):
        N, C, H, W = zz.shape
        zf = jnp.transpose(zz, (0, 2, 3, 1)).reshape(N, H * W, C)
        cf = jnp.transpose(cc, (0, 2, 3, 1)).reshape(N, H * W, C)
        feat = zf @ params["wz"] + cf @ params["wc"]
        ctx = jnp.mean(ca @ params["wt"], axis=1, keepdims=True)
        c_in = (1.0 / jnp.sqrt(sg * sg + 1.0))[:, None, None]
        o = (feat + ctx) * c_in
        return jnp.transpose(o.reshape(N, H, W, C), (0, 3, 1, 2))

    B = z.shape[0]
    cfg_z = jnp.concatenate([z, z, z], 0)
    cfg_s = jnp.concatenate([sigma, sigma, sigma], 0)
    cfg_ca = jnp.concatenate([cond["c_crossattn"][0], uncond["c_crossattn"][0],
                              uncond["c_crossattn"][0]], 0)
    cfg_cc = jnp.concatenate([cond["c_concat"][0], cond["c_concat"][0],
                              uncond["c_concat"][0]], 0)
    out = inner(cfg_z, cfg_s, cfg_ca, cfg_cc)
    oc, oic, ou = out[:B], out[B:2 * B], out[2 * B:]
    return ou + t_scale * (oc - oic) + i_scale * (oic - ou)


if __name__ == "__main__":
    B, C, H, W = 2, 4, 16, 16
    S, D = 8, 32

    key = jax.random.PRNGKey(0)
    k = jax.random.split(key, 8)

    z = jax.random.normal(k[0], (B, C, H, W), dtype=jnp.float32)
    sigma = jnp.abs(jax.random.normal(k[1], (B,), dtype=jnp.float32)) + 0.5
    cond = {
        "c_crossattn": [jax.random.normal(k[2], (B, S, D), dtype=jnp.float32)],
        "c_concat": [jax.random.normal(k[3], (B, C, H, W), dtype=jnp.float32)],
    }
    uncond = {
        "c_crossattn": [jax.random.normal(k[4], (B, S, D), dtype=jnp.float32)],
        "c_concat": [jnp.zeros((B, C, H, W), dtype=jnp.float32)],
    }
    # TODO(synk): the real inner_model is an external UNet; replaced here by a
    # deterministic linear surrogate (the fused-kernel structure stays valid,
    # but the algebraic CFG fold would not for a nonlinear model).
    params = {
        "wz": jax.random.normal(k[5], (C, C), dtype=jnp.float32) * 0.3,
        "wc": jax.random.normal(k[6], (C, C), dtype=jnp.float32) * 0.3,
        "wt": jax.random.normal(k[7], (D, C), dtype=jnp.float32) * 0.1,
    }

    text_cfg_scale = 7.5
    image_cfg_scale = 1.5

    out = cfg_denoiser_forward(z, sigma, cond, uncond,
                               text_cfg_scale, image_cfg_scale, params)
    out = jax.block_until_ready(out)

    ref = _reference(z, sigma, cond, uncond,
                     text_cfg_scale, image_cfg_scale, params)
    assert out.shape == (B, C, H, W)
    assert out.dtype == z.dtype
    assert jnp.allclose(out, ref, atol=1e-4, rtol=1e-4)

    print("KERNEL_OK")
</pallas_src>

<mosaic_0001>
module attributes {stable_mosaic.version = 11 : i64} {
  func.func @fused_cfg_kernel(%arg0: i32, %arg1: i32, %arg2: memref<3x2xf32, #tpu.memory_space<smem>>, %arg3: memref<2x4xf32, #tpu.memory_space<smem>>, %arg4: memref<4x4xf32, #tpu.memory_space<smem>>, %arg5: memref<4x4xf32, #tpu.memory_space<smem>>, %arg6: memref<1x4x2x128xf32, #tpu.memory_space<vmem>>, %arg7: memref<1x4x2x128xf32, #tpu.memory_space<vmem>>, %arg8: memref<1x4x2x128xf32, #tpu.memory_space<vmem>>, %arg9: memref<1x4x2x128xf32, #tpu.memory_space<vmem>>) attributes {dimension_semantics = [#tpu.dimension_semantics<parallel>, #tpu.dimension_semantics<parallel>], iteration_bounds = array<i64: 2, 1>, scalar_prefetch = 0 : i64, scratch_operands = 0 : i64, tpu.core_type = #tpu.core_type<tc>, window_params = [{transform_indices = @transform_0, window_bounds = array<i64: 3, 2>}, {transform_indices = @transform_1, window_bounds = array<i64: 2, 4>}, {transform_indices = @transform_2, window_bounds = array<i64: 4, 4>}, {transform_indices = @transform_3, window_bounds = array<i64: 4, 4>}, {transform_indices = @transform_4, window_bounds = array<i64: 1, 4, 2, 128>}, {transform_indices = @transform_5, window_bounds = array<i64: 1, 4, 2, 128>}, {transform_indices = @transform_6, window_bounds = array<i64: 1, 4, 2, 128>}, {transform_indices = @transform_7, window_bounds = array<i64: 1, 4, 2, 128>}]} {
    %c0 = arith.constant 0 : index
    %0 = arith.index_cast %arg0 : i32 to index
    %1 = memref.load %arg2[%c0, %0] : memref<3x2xf32, #tpu.memory_space<smem>>
    %c1 = arith.constant 1 : index
    %2 = arith.index_cast %arg0 : i32 to index
    %3 = memref.load %arg2[%c1, %2] : memref<3x2xf32, #tpu.memory_space<smem>>
    %c2 = arith.constant 2 : index
    %4 = arith.index_cast %arg0 : i32 to index
    %5 = memref.load %arg2[%c2, %4] : memref<3x2xf32, #tpu.memory_space<smem>>
    %c0_0 = arith.constant 0 : index
    %c0_1 = arith.constant 0 : index
    %6 = memref.load %arg4[%c0_0, %c0_1] : memref<4x4xf32, #tpu.memory_space<smem>>
    %7 = arith.mulf %1, %6 : f32
    %c0_2 = arith.constant 0 : index
    %c0_3 = arith.constant 0 : index
    %c0_4 = arith.constant 0 : index
    %c0_5 = arith.constant 0 : index
    %8 = vector.load %arg6[%c0_2, %c0_3, %c0_4, %c0_5] : memref<1x4x2x128xf32, #tpu.memory_space<vmem>>, vector<1x1x2x128xf32>
    %9 = vector.shape_cast %8 : vector<1x1x2x128xf32> to vector<2x128xf32>
    %10 = vector.broadcast %7 : f32 to vector<2x128xf32>
    %11 = arith.mulf %10, %9 : vector<2x128xf32>
    %c1_6 = arith.constant 1 : index
    %c0_7 = arith.constant 0 : index
    %12 = memref.load %arg4[%c1_6, %c0_7] : memref<4x4xf32, #tpu.memory_space<smem>>
    %13 = arith.mulf %1, %12 : f32
    %c0_8 = arith.constant 0 : index
    %c1_9 = arith.constant 1 : index
    %c0_10 = arith.constant 0 : index
    %c0_11 = arith.constant 0 : index
    %14 = vector.load %arg6[%c0_8, %c1_9, %c0_10, %c0_11] : memref<1x4x2x128xf32, #tpu.memory_space<vmem>>, vector<1x1x2x128xf32>
    %15 = vector.shape_cast %14 : vector<1x1x2x128xf32> to vector<2x128xf32>
    %16 = vector.broadcast %13 : f32 to vector<2x128xf32>
    %17 = arith.mulf %16, %15 : vector<2x128xf32>
    %18 = arith.addf %11, %17 : vector<2x128xf32>
    %c2_12 = arith.constant 2 : index
    %c0_13 = arith.constant 0 : index
    %19 = memref.load %arg4[%c2_12, %c0_13] : memref<4x4xf32, #tpu.memory_space<smem>>
    %20 = arith.mulf %1, %19 : f32
    %c0_14 = arith.constant 0 : index
    %c2_15 = arith.constant 2 : index
    %c0_16 = arith.constant 0 : index
    %c0_17 = arith.constant 0 : index
    %21 = vector.load %arg6[%c0_14, %c2_15, %c0_16, %c0_17] : memref<1x4x2x128xf32, #tpu.memory_space<vmem>>, vector<1x1x2x128xf32>
    %22 = vector.shape_cast %21 : vector<1x1x2x128xf32> to vector<2x128xf32>
    %23 = vector.broadcast %20 : f32 to vector<2x128xf32>
    %24 = arith.mulf %23, %22 : vector<2x128xf32>
    %25 = arith.addf %18, %24 : vector<2x128xf32>
    %c3 = arith.constant 3 : index
    %c0_18 = arith.constant 0 : index
    %26 = memref.load %arg4[%c3, %c0_18] : memref<4x4xf32, #tpu.memory_space<smem>>
    %27 = arith.mulf %1, %26 : f32
    %c0_19 = arith.constant 0 : index
    %c3_20 = arith.constant 3 : index
    %c0_21 = arith.constant 0 : index
    %c0_22 = arith.constant 0 : index
    %28 = vector.load %arg6[%c0_19, %c3_20, %c0_21, %c0_22] : memref<1x4x2x128xf32, #tpu.memory_space<vmem>>, vector<1x1x2x128xf32>
    %29 = vector.shape_cast %28 : vector<1x1x2x128xf32> to vector<2x128xf32>
    %30 = vector.broadcast %27 : f32 to vector<2x128xf32>
    %31 = arith.mulf %30, %29 : vector<2x128xf32>
    %32 = arith.addf %25, %31 : vector<2x128xf32>
    %c0_23 = arith.constant 0 : index
    %c0_24 = arith.constant 0 : index
    %33 = memref.load %arg5[%c0_23, %c0_24] : memref<4x4xf32, #tpu.memory_space<smem>>
    %34 = arith.mulf %3, %33 : f32
    %c0_25 = arith.constant 0 : index
    %c0_26 = arith.constant 0 : index
    %c0_27 = arith.constant 0 : index
    %c0_28 = arith.constant 0 : index
    %35 = vector.load %arg7[%c0_25, %c0_26, %c0_27, %c0_28] : memref<1x4x2x128xf32, #tpu.memory_space<vmem>>, vector<1x1x2x128xf32>
    %36 = vector.shape_cast %35 : vector<1x1x2x128xf32> to vector<2x128xf32>
    %37 = vector.broadcast %34 : f32 to vector<2x128xf32>
    %38 = arith.mulf %37, %36 : vector<2x128xf32>
    %39 = arith.addf %32, %38 : vector<2x128xf32>
    %c0_29 = arith.constant 0 : index
    %c0_30 = arith.constant 0 : index
    %40 = memref.load %arg5[%c0_29, %c0_30] : memref<4x4xf32, #tpu.memory_space<smem>>
    %41 = arith.mulf %5, %40 : f32
    %c0_31 = arith.constant 0 : index
    %c0_32 = arith.constant 0 : index
    %c0_33 = arith.constant 0 : index
    %c0_34 = arith.constant 0 : index
    %42 = vector.load %arg8[%c0_31, %c0_32, %c0_33, %c0_34] : memref<1x4x2x128xf32, #tpu.memory_space<vmem>>, vector<1x1x2x128xf32>
    %43 = vector.shape_cast %42 : vector<1x1x2x128xf32> to vector<2x128xf32>
    %44 = vector.broadcast %41 : f32 to vector<2x128xf32>
    %45 = arith.mulf %44, %43 : vector<2x128xf32>
    %46 = arith.addf %39, %45 : vector<2x128xf32>
    %c1_35 = arith.constant 1 : index
    %c0_36 = arith.constant 0 : index
    %47 = memref.load %arg5[%c1_35, %c0_36] : memref<4x4xf32, #tpu.memory_space<smem>>
    %48 = arith.mulf %3, %47 : f32
    %c0_37 = arith.constant 0 : index
    %c1_38 = arith.constant 1 : index
    %c0_39 = arith.constant 0 : index
    %c0_40 = arith.constant 0 : index
    %49 = vector.load %arg7[%c0_37, %c1_38, %c0_39, %c0_40] : memref<1x4x2x128xf32, #tpu.memory_space<vmem>>, vector<1x1x2x128xf32>
    %50 = vector.shape_cast %49 : vector<1x1x2x128xf32> to vector<2x128xf32>
    %51 = vector.broadcast %48 : f32 to vector<2x128xf32>
    %52 = arith.mulf %51, %50 : vector<2x128xf32>
    %53 = arith.addf %46, %52 : vector<2x128xf32>
    %c1_41 = arith.constant 1 : index
    %c0_42 = arith.constant 0 : index
    %54 = memref.load %arg5[%c1_41, %c0_42] : memref<4x4xf32, #tpu.memory_space<smem>>
    %55 = arith.mulf %5, %54 : f32
    %c0_43 = arith.constant 0 : index
    %c1_44 = arith.constant 1 : index
    %c0_45 = arith.constant 0 : index
    %c0_46 = arith.constant 0 : index
    %56 = vector.load %arg8[%c0_43, %c1_44, %c0_45, %c0_46] : memref<1x4x2x128xf32, #tpu.memory_space<vmem>>, vector<1x1x2x128xf32>
    %57 = vector.shape_cast %56 : vector<1x1x2x128xf32> to vector<2x128xf32>
    %58 = vector.broadcast %55 : f32 to vector<2x128xf32>
    %59 = arith.mulf %58, %57 : vector<2x128xf32>
    %60 = arith.addf %53, %59 : vector<2x128xf32>
    %c2_47 = arith.constant 2 : index
    %c0_48 = arith.constant 0 : index
    %61 = memref.load %arg5[%c2_47, %c0_48] : memref<4x4xf32, #tpu.memory_space<smem>>
    %62 = arith.mulf %3, %61 : f32
    %c0_49 = arith.constant 0 : index
    %c2_50 = arith.constant 2 : index
    %c0_51 = arith.constant 0 : index
    %c0_52 = arith.constant 0 : index
    %63 = vector.load %arg7[%c0_49, %c2_50, %c0_51, %c0_52] : memref<1x4x2x128xf32, #tpu.memory_space<vmem>>, vector<1x1x2x128xf32>
    %64 = vector.shape_cast %63 : vector<1x1x2x128xf32> to vector<2x128xf32>
    %65 = vector.broadcast %62 : f32 to vector<2x128xf32>
    %66 = arith.mulf %65, %64 : vector<2x128xf32>
    %67 = arith.addf %60, %66 : vector<2x128xf32>
    %c2_53 = arith.constant 2 : index
    %c0_54 = arith.constant 0 : index
    %68 = memref.load %arg5[%c2_53, %c0_54] : memref<4x4xf32, #tpu.memory_space<smem>>
    %69 = arith.mulf %5, %68 : f32
    %c0_55 = arith.constant 0 : index
    %c2_56 = arith.constant 2 : index
    %c0_57 = arith.constant 0 : index
    %c0_58 = arith.constant 0 : index
    %70 = vector.load %arg8[%c0_55, %c2_56, %c0_57, %c0_58] : memref<1x4x2x128xf32, #tpu.memory_space<vmem>>, vector<1x1x2x128xf32>
    %71 = vector.shape_cast %70 : vector<1x1x2x128xf32> to vector<2x128xf32>
    %72 = vector.broadcast %69 : f32 to vector<2x128xf32>
    %73 = arith.mulf %72, %71 : vector<2x128xf32>
    %74 = arith.addf %67, %73 : vector<2x128xf32>
    %c3_59 = arith.constant 3 : index
    %c0_60 = arith.constant 0 : index
    %75 = memref.load %arg5[%c3_59, %c0_60] : memref<4x4xf32, #tpu.memory_space<smem>>
    %76 = arith.mulf %3, %75 : f32
    %c0_61 = arith.constant 0 : index
    %c3_62 = arith.constant 3 : index
    %c0_63 = arith.constant 0 : index
    %c0_64 = arith.constant 0 : index
    %77 = vector.load %arg7[%c0_61, %c3_62, %c0_63, %c0_64] : memref<1x4x2x128xf32, #tpu.memory_space<vmem>>, vector<1x1x2x128xf32>
    %78 = vector.shape_cast %77 : vector<1x1x2x128xf32> to vector<2x128xf32>
    %79 = vector.broadcast %76 : f32 to vector<2x128xf32>
    %80 = arith.mulf %79, %78 : vector<2x128xf32>
    %81 = arith.addf %74, %80 : vector<2x128xf32>
    %c3_65 = arith.constant 3 : index
    %c0_66 = arith.constant 0 : index
    %82 = memref.load %arg5[%c3_65, %c0_66] : memref<4x4xf32, #tpu.memory_space<smem>>
    %83 = arith.mulf %5, %82 : f32
    %c0_67 = arith.constant 0 : index
    %c3_68 = arith.constant 3 : index
    %c0_69 = arith.constant 0 : index
    %c0_70 = arith.constant 0 : index
    %84 = vector.load %arg8[%c0_67, %c3_68, %c0_69, %c0_70] : memref<1x4x2x128xf32, #tpu.memory_space<vmem>>, vector<1x1x2x128xf32>
    %85 = vector.shape_cast %84 : vector<1x1x2x128xf32> to vector<2x128xf32>
    %86 = vector.broadcast %83 : f32 to vector<2x128xf32>
    %87 = arith.mulf %86, %85 : vector<2x128xf32>
    %88 = arith.addf %81, %87 : vector<2x128xf32>
    %89 = arith.index_cast %arg0 : i32 to index
    %c0_71 = arith.constant 0 : index
    %90 = memref.load %arg3[%89, %c0_71] : memref<2x4xf32, #tpu.memory_space<smem>>
    %91 = vector.broadcast %90 : f32 to vector<2x128xf32>
    %92 = arith.addf %88, %91 : vector<2x128xf32>
    %c0_72 = arith.constant 0 : index
    %c0_73 = arith.constant 0 : index
    %c0_74 = arith.constant 0 : index
    %c0_75 = arith.constant 0 : index
    %93 = vector.load %arg9[%c0_72, %c0_73, %c0_74, %c0_75] : memref<1x4x2x128xf32, #tpu.memory_space<vmem>>, vector<1x1x2x128xf32>
    %94 = vector.shape_cast %93 : vector<1x1x2x128xf32> to vector<2x128xf32>
    %95 = vector.shape_cast %92 : vector<2x128xf32> to vector<1x1x2x128xf32>
    tpu.vector_store %arg9[%c0_72, %c0_73, %c0_74, %c0_75], %95 {strides = array<i32>} : memref<1x4x2x128xf32, #tpu.memory_space<vmem>>, vector<1x1x2x128xf32>,
    %c0_76 = arith.constant 0 : index
    %c1_77 = arith.constant 1 : index
    %96 = memref.load %arg4[%c0_76, %c1_77] : memref<4x4xf32, #tpu.memory_space<smem>>
    %97 = arith.mulf %1, %96 : f32
    %c0_78 = arith.constant 0 : index
    %c0_79 = arith.constant 0 : index
    %c0_80 = arith.constant 0 : index
    %c0_81 = arith.constant 0 : index
    %98 = vector.load %arg6[%c0_78, %c0_79, %c0_80, %c0_81] : memref<1x4x2x128xf32, #tpu.memory_space<vmem>>, vector<1x1x2x128xf32>
    %99 = vector.shape_cast %98 : vector<1x1x2x128xf32> to vector<2x128xf32>
    %100 = vector.broadcast %97 : f32 to vector<2x128xf32>
    %101 = arith.mulf %100, %99 : vector<2x128xf32>
    %c1_82 = arith.constant 1 : index
    %c1_83 = arith.constant 1 : index
    %102 = memref.load %arg4[%c1_82, %c1_83] : memref<4x4xf32, #tpu.memory_space<smem>>
    %103 = arith.mulf %1, %102 : f32
    %c0_84 = arith.constant 0 : index
    %c1_85 = arith.constant 1 : index
    %c0_86 = arith.constant 0 : index
    %c0_87 = arith.constant 0 : index
    %104 = vector.load %arg6[%c0_84, %c1_85, %c0_86, %c0_87] : memref<1x4x2x128xf32, #tpu.memory_space<vmem>>, vector<1x1x2x128xf32>
    %105 = vector.shape_cast %104 : vector<1x1x2x128xf32> to vector<2x128xf32>
    %106 = vector.broadcast %103 : f32 to vector<2x128xf32>
    %107 = arith.mulf %106, %105 : vector<2x128xf32>
    %108 = arith.addf %101, %107 : vector<2x128xf32>
    %c2_88 = arith.constant 2 : index
    %c1_89 = arith.constant 1 : index
    %109 = memref.load %arg4[%c2_88, %c1_89] : memref<4x4xf32, #tpu.memory_space<smem>>
    %110 = arith.mulf %1, %109 : f32
    %c0_90 = arith.constant 0 : index
    %c2_91 = arith.constant 2 : index
    %c0_92 = arith.constant 0 : index
    %c0_93 = arith.constant 0 : index
    %111 = vector.load %arg6[%c0_90, %c2_91, %c0_92, %c0_93] : memref<1x4x2x128xf32, #tpu.memory_space<vmem>>, vector<1x1x2x128xf32>
    %112 = vector.shape_cast %111 : vector<1x1x2x128xf32> to vector<2x128xf32>
    %113 = vector.broadcast %110 : f32 to vector<2x128xf32>
    %114 = arith.mulf %113, %112 : vector<2x128xf32>
    %115 = arith.addf %108, %114 : vector<2x128xf32>
    %c3_94 = arith.constant 3 : index
    %c1_95 = arith.constant 1 : index
    %116 = memref.load %arg4[%c3_94, %c1_95] : memref<4x4xf32, #tpu.memory_space<smem>>
    %117 = arith.mulf %1, %116 : f32
    %c0_96 = arith.constant 0 : index
    %c3_97 = arith.constant 3 : index
    %c0_98 = arith.constant 0 : index
    %c0_99 = arith.constant 0 : index
    %118 = vector.load %arg6[%c0_96, %c3_97, %c0_98, %c0_99] : memref<1x4x2x128xf32, #tpu.memory_space<vmem>>, vector<1x1x2x128xf32>
    %119 = vector.shape_cast %118 : vector<1x1x2x128xf32> to vector<2x128xf32>
    %120 = vector.broadcast %117 : f32 to vector<2x128xf32>
    %121 = arith.mulf %120, %119 : vector<2x128xf32>
    %122 = arith.addf %115, %121 : vector<2x128xf32>
    %c0_100 = arith.constant 0 : index
    %c1_101 = arith.constant 1 : index
    %123 = memref.load %arg5[%c0_100, %c1_101] : memref<4x4xf32, #tpu.memory_space<smem>>
    %124 = arith.mulf %3, %123 : f32
    %c0_102 = arith.constant 0 : index
    %c0_103 = arith.constant 0 : index
    %c0_104 = arith.constant 0 : index
    %c0_105 = arith.constant 0 : index
    %125 = vector.load %arg7[%c0_102, %c0_103, %c0_104, %c0_105] : memref<1x4x2x128xf32, #tpu.memory_space<vmem>>, vector<1x1x2x128xf32>
    %126 = vector.shape_cast %125 : vector<1x1x2x128xf32> to vector<2x128xf32>
    %127 = vector.broadcast %124 : f32 to vector<2x128xf32>
    %128 = arith.mulf %127, %126 : vector<2x128xf32>
    %129 = arith.addf %122, %128 : vector<2x128xf32>
    %c0_106 = arith.constant 0 : index
    %c1_107 = arith.constant 1 : index
    %130 = memref.load %arg5[%c0_106, %c1_107] : memref<4x4xf32, #tpu.memory_space<smem>>
    %131 = arith.mulf %5, %130 : f32
    %c0_108 = arith.constant 0 : index
    %c0_109 = arith.constant 0 : index
    %c0_110 = arith.constant 0 : index
    %c0_111 = arith.constant 0 : index
    %132 = vector.load %arg8[%c0_108, %c0_109, %c0_110, %c0_111] : memref<1x4x2x128xf32, #tpu.memory_space<vmem>>, vector<1x1x2x128xf32>
    %133 = vector.shape_cast %132 : vector<1x1x2x128xf32> to vector<2x128xf32>
    %134 = vector.broadcast %131 : f32 to vector<2x128xf32>
    %135 = arith.mulf %134, %133 : vector<2x128xf32>
    %136 = arith.addf %129, %135 : vector<2x128xf32>
    %c1_112 = arith.constant 1 : index
    %c1_113 = arith.constant 1 : index
    %137 = memref.load %arg5[%c1_112, %c1_113] : memref<4x4xf32, #tpu.memory_space<smem>>
    %138 = arith.mulf %3, %137 : f32
    %c0_114 = arith.constant 0 : index
    %c1_115 = arith.constant 1 : index
    %c0_116 = arith.constant 0 : index
    %c0_117 = arith.constant 0 : index
    %139 = vector.load %arg7[%c0_114, %c1_115, %c0_116, %c0_117] : memref<1x4x2x128xf32, #tpu.memory_space<vmem>>, vector<1x1x2x128xf32>
    %140 = vector.shape_cast %139 : vector<1x1x2x128xf32> to vector<2x128xf32>
    %141 = vector.broadcast %138 : f32 to vector<2x128xf32>
    %142 = arith.mulf %141, %140 : vector<2x128xf32>
    %143 = arith.addf %136, %142 : vector<2x128xf32>
    %c1_118 = arith.constant 1 : index
    %c1_119 = arith.constant 1 : index
    %144 = memref.load %arg5[%c1_118, %c1_119] : memref<4x4xf32, #tpu.memory_space<smem>>
    %145 = arith.mulf %5, %144 : f32
    %c0_120 = arith.constant 0 : index
    %c1_121 = arith.constant 1 : index
    %c0_122 = arith.constant 0 : index
    %c0_123 = arith.constant 0 : index
    %146 = vector.load %arg8[%c0_120, %c1_121, %c0_122, %c0_123] : memref<1x4x2x128xf32, #tpu.memory_space<vmem>>, vector<1x1x2x128xf32>
    %147 = vector.shape_cast %146 : vector<1x1x2x128xf32> to vector<2x128xf32>
    %148 = vector.broadcast %145 : f32 to vector<2x128xf32>
    %149 = arith.mulf %148, %147 : vector<2x128xf32>
    %150 = arith.addf %143, %149 : vector<2x128xf32>
    %c2_124 = arith.constant 2 : index
    %c1_125 = arith.constant 1 : index
    %151 = memref.load %arg5[%c2_124, %c1_125] : memref<4x4xf32, #tpu.memory_space<smem>>
    %152 = arith.mulf %3, %151 : f32
    %c0_126 = arith.constant 0 : index
    %c2_127 = arith.constant 2 : index
    %c0_128 = arith.constant 0 : index
    %c0_129 = arith.constant 0 : index
    %153 = vector.load %arg7[%c0_126, %c2_127, %c0_128, %c0_129] : memref<1x4x2x128xf32, #tpu.memory_space<vmem>>, vector<1x1x2x128xf32>
    %154 = vector.shape_cast %153 : vector<1x1x2x128xf32> to vector<2x128xf32>
    %155 = vector.broadcast %152 : f32 to vector<2x128xf32>
    %156 = arith.mulf %155, %154 : vector<2x128xf32>
    %157 = arith.addf %150, %156 : vector<2x128xf32>
    %c2_130 = arith.constant 2 : index
    %c1_131 = arith.constant 1 : index
    %158 = memref.load %arg5[%c2_130, %c1_131] : memref<4x4xf32, #tpu.memory_space<smem>>
    %159 = arith.mulf %5, %158 : f32
    %c0_132 = arith.constant 0 : index
    %c2_133 = arith.constant 2 : index
    %c0_134 = arith.constant 0 : index
    %c0_135 = arith.constant 0 : index
    %160 = vector.load %arg8[%c0_132, %c2_133, %c0_134, %c0_135] : memref<1x4x2x128xf32, #tpu.memory_space<vmem>>, vector<1x1x2x128xf32>
    %161 = vector.shape_cast %160 : vector<1x1x2x128xf32> to vector<2x128xf32>
    %162 = vector.broadcast %159 : f32 to vector<2x128xf32>
    %163 = arith.mulf %162, %161 : vector<2x128xf32>
    %164 = arith.addf %157, %163 : vector<2x128xf32>
    %c3_136 = arith.constant 3 : index
    %c1_137 = arith.constant 1 : index
    %165 = memref.load %arg5[%c3_136, %c1_137] : memref<4x4xf32, #tpu.memory_space<smem>>
    %166 = arith.mulf %3, %165 : f32
    %c0_138 = arith.constant 0 : index
    %c3_139 = arith.constant 3 : index
    %c0_140 = arith.constant 0 : index
    %c0_141 = arith.constant 0 : index
    %167 = vector.load %arg7[%c0_138, %c3_139, %c0_140, %c0_141] : memref<1x4x2x128xf32, #tpu.memory_space<vmem>>, vector<1x1x2x128xf32>
    %168 = vector.shape_cast %167 : vector<1x1x2x128xf32> to vector<2x128xf32>
    %169 = vector.broadcast %166 : f32 to vector<2x128xf32>
    %170 = arith.mulf %169, %168 : vector<2x128xf32>
    %171 = arith.addf %164, %170 : vector<2x128xf32>
    %c3_142 = arith.constant 3 : index
    %c1_143 = arith.constant 1 : index
    %172 = memref.load %arg5[%c3_142, %c1_143] : memref<4x4xf32, #tpu.memory_space<smem>>
    %173 = arith.mulf %5, %172 : f32
    %c0_144 = arith.constant 0 : index
    %c3_145 = arith.constant 3 : index
    %c0_146 = arith.constant 0 : index
    %c0_147 = arith.constant 0 : index
    %174 = vector.load %arg8[%c0_144, %c3_145, %c0_146, %c0_147] : memref<1x4x2x128xf32, #tpu.memory_space<vmem>>, vector<1x1x2x128xf32>
    %175 = vector.shape_cast %174 : vector<1x1x2x128xf32> to vector<2x128xf32>
    %176 = vector.broadcast %173 : f32 to vector<2x128xf32>
    %177 = arith.mulf %176, %175 : vector<2x128xf32>
    %178 = arith.addf %171, %177 : vector<2x128xf32>
    %179 = arith.index_cast %arg0 : i32 to index
    %c1_148 = arith.constant 1 : index
    %180 = memref.load %arg3[%179, %c1_148] : memref<2x4xf32, #tpu.memory_space<smem>>
    %181 = vector.broadcast %180 : f32 to vector<2x128xf32>
    %182 = arith.addf %178, %181 : vector<2x128xf32>
    %c0_149 = arith.constant 0 : index
    %c1_150 = arith.constant 1 : index
    %c0_151 = arith.constant 0 : index
    %c0_152 = arith.constant 0 : index
    %183 = vector.load %arg9[%c0_149, %c1_150, %c0_151, %c0_152] : memref<1x4x2x128xf32, #tpu.memory_space<vmem>>, vector<1x1x2x128xf32>
    %184 = vector.shape_cast %183 : vector<1x1x2x128xf32> to vector<2x128xf32>
    %185 = vector.shape_cast %182 : vector<2x128xf32> to vector<1x1x2x128xf32>
    tpu.vector_store %arg9[%c0_149, %c1_150, %c0_151, %c0_152], %185 {strides = array<i32>} : memref<1x4x2x128xf32, #tpu.memory_space<vmem>>, vector<1x1x2x128xf32>,
    %c0_153 = arith.constant 0 : index
    %c2_154 = arith.constant 2 : index
    %186 = memref.load %arg4[%c0_153, %c2_154] : memref<4x4xf32, #tpu.memory_space<smem>>
    %187 = arith.mulf %1, %186 : f32
    %c0_155 = arith.constant 0 : index
    %c0_156 = arith.constant 0 : index
    %c0_157 = arith.constant 0 : index
    %c0_158 = arith.constant 0 : index
    %188 = vector.load %arg6[%c0_155, %c0_156, %c0_157, %c0_158] : memref<1x4x2x128xf32, #tpu.memory_space<vmem>>, vector<1x1x2x128xf32>
    %189 = vector.shape_cast %188 : vector<1x1x2x128xf32> to vector<2x128xf32>
    %190 = vector.broadcast %187 : f32 to vector<2x128xf32>
    %191 = arith.mulf %190, %189 : vector<2x128xf32>
    %c1_159 = arith.constant 1 : index
    %c2_160 = arith.constant 2 : index
    %192 = memref.load %arg4[%c1_159, %c2_160] : memref<4x4xf32, #tpu.memory_space<smem>>
    %193 = arith.mulf %1, %192 : f32
    %c0_161 = arith.constant 0 : index
    %c1_162 = arith.constant 1 : index
    %c0_163 = arith.constant 0 : index
    %c0_164 = arith.constant 0 : index
    %194 = vector.load %arg6[%c0_161, %c1_162, %c0_163, %c0_164] : memref<1x4x2x128xf32, #tpu.memory_space<vmem>>, vector<1x1x2x128xf32>
    %195 = vector.shape_cast %194 : vector<1x1x2x128xf32> to vector<2x128xf32>
    %196 = vector.broadcast %193 : f32 to vector<2x128xf32>
    %197 = arith.mulf %196, %195 : vector<2x128xf32>
    %198 = arith.addf %191, %197 : vector<2x128xf32>
    %c2_165 = arith.constant 2 : index
    %c2_166 = arith.constant 2 : index
    %199 = memref.load %arg4[%c2_165, %c2_166] : memref<4x4xf32, #tpu.memory_space<smem>>
    %200 = arith.mulf %1, %199 : f32
    %c0_167 = arith.constant 0 : index
    %c2_168 = arith.constant 2 : index
    %c0_169 = arith.constant 0 : index
    %c0_170 = arith.constant 0 : index
    %201 = vector.load %arg6[%c0_167, %c2_168, %c0_169, %c0_170] : memref<1x4x2x128xf32, #tpu.memory_space<vmem>>, vector<1x1x2x128xf32>
    %202 = vector.shape_cast %201 : vector<1x1x2x128xf32> to vector<2x128xf32>
    %203 = vector.broadcast %200 : f32 to vector<2x128xf32>
    %204 = arith.mulf %203, %202 : vector<2x128xf32>
    %205 = arith.addf %198, %204 : vector<2x128xf32>
    %c3_171 = arith.constant 3 : index
    %c2_172 = arith.constant 2 : index
    %206 = memref.load %arg4[%c3_171, %c2_172] : memref<4x4xf32, #tpu.memory_space<smem>>
    %207 = arith.mulf %1, %206 : f32
    %c0_173 = arith.constant 0 : index
    %c3_174 = arith.constant 3 : index
    %c0_175 = arith.constant 0 : index
    %c0_176 = arith.constant 0 : index
    %208 = vector.load %arg6[%c0_173, %c3_174, %c0_175, %c0_176] : memref<1x4x2x128xf32, #tpu.memory_space<vmem>>, vector<1x1x2x128xf32>
    %209 = vector.shape_cast %208 : vector<1x1x2x128xf32> to vector<2x128xf32>
    %210 = vector.broadcast %207 : f32 to vector<2x128xf32>
    %211 = arith.mulf %210, %209 : vector<2x128xf32>
    %212 = arith.addf %205, %211 : vector<2x128xf32>
    %c0_177 = arith.constant 0 : index
    %c2_178 = arith.constant 2 : index
    %213 = memref.load %arg5[%c0_177, %c2_178] : memref<4x4xf32, #tpu.memory_space<smem>>
    %214 = arith.mulf %3, %213 : f32
    %c0_179 = arith.constant 0 : index
    %c0_180 = arith.constant 0 : index
    %c0_181 = arith.constant 0 : index
    %c0_182 = arith.constant 0 : index
    %215 = vector.load %arg7[%c0_179, %c0_180, %c0_181, %c0_182] : memref<1x4x2x128xf32, #tpu.memory_space<vmem>>, vector<1x1x2x128xf32>
    %216 = vector.shape_cast %215 : vector<1x1x2x128xf32> to vector<2x128xf32>
    %217 = vector.broadcast %214 : f32 to vector<2x128xf32>
    %218 = arith.mulf %217, %216 : vector<2x128xf32>
    %219 = arith.addf %212, %218 : vector<2x128xf32>
    %c0_183 = arith.constant 0 : index
    %c2_184 = arith.constant 2 : index
    %220 = memref.load %arg5[%c0_183, %c2_184] : memref<4x4xf32, #tpu.memory_space<smem>>
    %221 = arith.mulf %5, %220 : f32
    %c0_185 = arith.constant 0 : index
    %c0_186 = arith.constant 0 : index
    %c0_187 = arith.constant 0 : index
    %c0_188 = arith.constant 0 : index
    %222 = vector.load %arg8[%c0_185, %c0_186, %c0_187, %c0_188] : memref<1x4x2x128xf32, #tpu.memory_space<vmem>>, vector<1x1x2x128xf32>
    %223 = vector.shape_cast %222 : vector<1x1x2x128xf32> to vector<2x128xf32>
    %224 = vector.broadcast %221 : f32 to vector<2x128xf32>
    %225 = arith.mulf %224, %223 : vector<2x128xf32>
    %226 = arith.addf %219, %225 : vector<2x128xf32>
    %c1_189 = arith.constant 1 : index
    %c2_190 = arith.constant 2 : index
    %227 = memref.load %arg5[%c1_189, %c2_190] : memref<4x4xf32, #tpu.memory_space<smem>>
    %228 = arith.mulf %3, %227 : f32
    %c0_191 = arith.constant 0 : index
    %c1_192 = arith.constant 1 : index
    %c0_193 = arith.constant 0 : index
    %c0_194 = arith.constant 0 : index
    %229 = vector.load %arg7[%c0_191, %c1_192, %c0_193, %c0_194] : memref<1x4x2x128xf32, #tpu.memory_space<vmem>>, vector<1x1x2x128xf32>
    %230 = vector.shape_cast %229 : vector<1x1x2x128xf32> to vector<2x128xf32>
    %231 = vector.broadcast %228 : f32 to vector<2x128xf32>
    %232 = arith.mulf %231, %230 : vector<2x128xf32>
    %233 = arith.addf %226, %232 : vector<2x128xf32>
    %c1_195 = arith.constant 1 : index
    %c2_196 = arith.constant 2 : index
    %234 = memref.load %arg5[%c1_195, %c2_196] : memref<4x4xf32, #tpu.memory_space<smem>>
    %235 = arith.mulf %5, %234 : f32
    %c0_197 = arith.constant 0 : index
    %c1_198 = arith.constant 1 : index
    %c0_199 = arith.constant 0 : index
    %c0_200 = arith.constant 0 : index
    %236 = vector.load %arg8[%c0_197, %c1_198, %c0_199, %c0_200] : memref<1x4x2x128xf32, #tpu.memory_space<vmem>>, vector<1x1x2x128xf32>
    %237 = vector.shape_cast %236 : vector<1x1x2x128xf32> to vector<2x128xf32>
    %238 = vector.broadcast %235 : f32 to vector<2x128xf32>
    %239 = arith.mulf %238, %237 : vector<2x128xf32>
    %240 = arith.addf %233, %239 : vector<2x128xf32>
    %c2_201 = arith.constant 2 : index
    %c2_202 = arith.constant 2 : index
    %241 = memref.load %arg5[%c2_201, %c2_202] : memref<4x4xf32, #tpu.memory_space<smem>>
    %242 = arith.mulf %3, %241 : f32
    %c0_203 = arith.constant 0 : index
    %c2_204 = arith.constant 2 : index
    %c0_205 = arith.constant 0 : index
    %c0_206 = arith.constant 0 : index
    %243 = vector.load %arg7[%c0_203, %c2_204, %c0_205, %c0_206] : memref<1x4x2x128xf32, #tpu.memory_space<vmem>>, vector<1x1x2x128xf32>
    %244 = vector.shape_cast %243 : vector<1x1x2x128xf32> to vector<2x128xf32>
    %245 = vector.broadcast %242 : f32 to vector<2x128xf32>
    %246 = arith.mulf %245, %244 : vector<2x128xf32>
    %247 = arith.addf %240, %246 : vector<2x128xf32>
    %c2_207 = arith.constant 2 : index
    %c2_208 = arith.constant 2 : index
    %248 = memref.load %arg5[%c2_207, %c2_208] : memref<4x4xf32, #tpu.memory_space<smem>>
    %249 = arith.mulf %5, %248 : f32
    %c0_209 = arith.constant 0 : index
    %c2_210 = arith.constant 2 : index
    %c0_211 = arith.constant 0 : index
    %c0_212 = arith.constant 0 : index
    %250 = vector.load %arg8[%c0_209, %c2_210, %c0_211, %c0_212] : memref<1x4x2x128xf32, #tpu.memory_space<vmem>>, vector<1x1x2x128xf32>
    %251 = vector.shape_cast %250 : vector<1x1x2x128xf32> to vector<2x128xf32>
    %252 = vector.broadcast %249 : f32 to vector<2x128xf32>
    %253 = arith.mulf %252, %251 : vector<2x128xf32>
    %254 = arith.addf %247, %253 : vector<2x128xf32>
    %c3_213 = arith.constant 3 : index
    %c2_214 = arith.constant 2 : index
    %255 = memref.load %arg5[%c3_213, %c2_214] : memref<4x4xf32, #tpu.memory_space<smem>>
    %256 = arith.mulf %3, %255 : f32
    %c0_215 = arith.constant 0 : index
    %c3_216 = arith.constant 3 : index
    %c0_217 = arith.constant 0 : index
    %c0_218 = arith.constant 0 : index
    %257 = vector.load %arg7[%c0_215, %c3_216, %c0_217, %c0_218] : memref<1x4x2x128xf32, #tpu.memory_space<vmem>>, vector<1x1x2x128xf32>
    %258 = vector.shape_cast %257 : vector<1x1x2x128xf32> to vector<2x128xf32>
    %259 = vector.broadcast %256 : f32 to vector<2x128xf32>
    %260 = arith.mulf %259, %258 : vector<2x128xf32>
    %261 = arith.addf %254, %260 : vector<2x128xf32>
    %c3_219 = arith.constant 3 : index
    %c2_220 = arith.constant 2 : index
    %262 = memref.load %arg5[%c3_219, %c2_220] : memref<4x4xf32, #tpu.memory_space<smem>>
    %263 = arith.mulf %5, %262 : f32
    %c0_221 = arith.constant 0 : index
    %c3_222 = arith.constant 3 : index
    %c0_223 = arith.constant 0 : index
    %c0_224 = arith.constant 0 : index
    %264 = vector.load %arg8[%c0_221, %c3_222, %c0_223, %c0_224] : memref<1x4x2x128xf32, #tpu.memory_space<vmem>>, vector<1x1x2x128xf32>
    %265 = vector.shape_cast %264 : vector<1x1x2x128xf32> to vector<2x128xf32>
    %266 = vector.broadcast %263 : f32 to vector<2x128xf32>
    %267 = arith.mulf %266, %265 : vector<2x128xf32>
    %268 = arith.addf %261, %267 : vector<2x128xf32>
    %269 = arith.index_cast %arg0 : i32 to index
    %c2_225 = arith.constant 2 : index
    %270 = memref.load %arg3[%269, %c2_225] : memref<2x4xf32, #tpu.memory_space<smem>>
    %271 = vector.broadcast %270 : f32 to vector<2x128xf32>
    %272 = arith.addf %268, %271 : vector<2x128xf32>
    %c0_226 = arith.constant 0 : index
    %c2_227 = arith.constant 2 : index
    %c0_228 = arith.constant 0 : index
    %c0_229 = arith.constant 0 : index
    %273 = vector.load %arg9[%c0_226, %c2_227, %c0_228, %c0_229] : memref<1x4x2x128xf32, #tpu.memory_space<vmem>>, vector<1x1x2x128xf32>
    %274 = vector.shape_cast %273 : vector<1x1x2x128xf32> to vector<2x128xf32>
    %275 = vector.shape_cast %272 : vector<2x128xf32> to vector<1x1x2x128xf32>
    tpu.vector_store %arg9[%c0_226, %c2_227, %c0_228, %c0_229], %275 {strides = array<i32>} : memref<1x4x2x128xf32, #tpu.memory_space<vmem>>, vector<1x1x2x128xf32>,
    %c0_230 = arith.constant 0 : index
    %c3_231 = arith.constant 3 : index
    %276 = memref.load %arg4[%c0_230, %c3_231] : memref<4x4xf32, #tpu.memory_space<smem>>
    %277 = arith.mulf %1, %276 : f32
    %c0_232 = arith.constant 0 : index
    %c0_233 = arith.constant 0 : index
    %c0_234 = arith.constant 0 : index
    %c0_235 = arith.constant 0 : index
    %278 = vector.load %arg6[%c0_232, %c0_233, %c0_234, %c0_235] : memref<1x4x2x128xf32, #tpu.memory_space<vmem>>, vector<1x1x2x128xf32>
    %279 = vector.shape_cast %278 : vector<1x1x2x128xf32> to vector<2x128xf32>
    %280 = vector.broadcast %277 : f32 to vector<2x128xf32>
    %281 = arith.mulf %280, %279 : vector<2x128xf32>
    %c1_236 = arith.constant 1 : index
    %c3_237 = arith.constant 3 : index
    %282 = memref.load %arg4[%c1_236, %c3_237] : memref<4x4xf32, #tpu.memory_space<smem>>
    %283 = arith.mulf %1, %282 : f32
    %c0_238 = arith.constant 0 : index
    %c1_239 = arith.constant 1 : index
    %c0_240 = arith.constant 0 : index
    %c0_241 = arith.constant 0 : index
    %284 = vector.load %arg6[%c0_238, %c1_239, %c0_240, %c0_241] : memref<1x4x2x128xf32, #tpu.memory_space<vmem>>, vector<1x1x2x128xf32>
    %285 = vector.shape_cast %284 : vector<1x1x2x128xf32> to vector<2x128xf32>
    %286 = vector.broadcast %283 : f32 to vector<2x128xf32>
    %287 = arith.mulf %286, %285 : vector<2x128xf32>
    %288 = arith.addf %281, %287 : vector<2x128xf32>
    %c2_242 = arith.constant 2 : index
    %c3_243 = arith.constant 3 : index
    %289 = memref.load %arg4[%c2_242, %c3_243] : memref<4x4xf32, #tpu.memory_space<smem>>
    %290 = arith.mulf %1, %289 : f32
    %c0_244 = arith.constant 0 : index
    %c2_245 = arith.constant 2 : index
    %c0_246 = arith.constant 0 : index
    %c0_247 = arith.constant 0 : index
    %291 = vector.load %arg6[%c0_244, %c2_245, %c0_246, %c0_247] : memref<1x4x2x128xf32, #tpu.memory_space<vmem>>, vector<1x1x2x128xf32>
    %292 = vector.shape_cast %291 : vector<1x1x2x128xf32> to vector<2x128xf32>
    %293 = vector.broadcast %290 : f32 to vector<2x128xf32>
    %294 = arith.mulf %293, %292 : vector<2x128xf32>
    %295 = arith.addf %288, %294 : vector<2x128xf32>
    %c3_248 = arith.constant 3 : index
    %c3_249 = arith.constant 3 : index
    %296 = memref.load %arg4[%c3_248, %c3_249] : memref<4x4xf32, #tpu.memory_space<smem>>
    %297 = arith.mulf %1, %296 : f32
    %c0_250 = arith.constant 0 : index
    %c3_251 = arith.constant 3 : index
    %c0_252 = arith.constant 0 : index
    %c0_253 = arith.constant 0 : index
    %298 = vector.load %arg6[%c0_250, %c3_251, %c0_252, %c0_253] : memref<1x4x2x128xf32, #tpu.memory_space<vmem>>, vector<1x1x2x128xf32>
    %299 = vector.shape_cast %298 : vector<1x1x2x128xf32> to vector<2x128xf32>
    %300 = vector.broadcast %297 : f32 to vector<2x128xf32>
    %301 = arith.mulf %300, %299 : vector<2x128xf32>
    %302 = arith.addf %295, %301 : vector<2x128xf32>
    %c0_254 = arith.constant 0 : index
    %c3_255 = arith.constant 3 : index
    %303 = memref.load %arg5[%c0_254, %c3_255] : memref<4x4xf32, #tpu.memory_space<smem>>
    %304 = arith.mulf %3, %303 : f32
    %c0_256 = arith.constant 0 : index
    %c0_257 = arith.constant 0 : index
    %c0_258 = arith.constant 0 : index
    %c0_259 = arith.constant 0 : index
    %305 = vector.load %arg7[%c0_256, %c0_257, %c0_258, %c0_259] : memref<1x4x2x128xf32, #tpu.memory_space<vmem>>, vector<1x1x2x128xf32>
    %306 = vector.shape_cast %305 : vector<1x1x2x128xf32> to vector<2x128xf32>
    %307 = vector.broadcast %304 : f32 to vector<2x128xf32>
    %308 = arith.mulf %307, %306 : vector<2x128xf32>
    %309 = arith.addf %302, %308 : vector<2x128xf32>
    %c0_260 = arith.constant 0 : index
    %c3_261 = arith.constant 3 : index
    %310 = memref.load %arg5[%c0_260, %c3_261] : memref<4x4xf32, #tpu.memory_space<smem>>
    %311 = arith.mulf %5, %310 : f32
    %c0_262 = arith.constant 0 : index
    %c0_263 = arith.constant 0 : index
    %c0_264 = arith.constant 0 : index
    %c0_265 = arith.constant 0 : index
    %312 = vector.load %arg8[%c0_262, %c0_263, %c0_264, %c0_265] : memref<1x4x2x128xf32, #tpu.memory_space<vmem>>, vector<1x1x2x128xf32>
    %313 = vector.shape_cast %312 : vector<1x1x2x128xf32> to vector<2x128xf32>
    %314 = vector.broadcast %311 : f32 to vector<2x128xf32>
    %315 = arith.mulf %314, %313 : vector<2x128xf32>
    %316 = arith.addf %309, %315 : vector<2x128xf32>
    %c1_266 = arith.constant 1 : index
    %c3_267 = arith.constant 3 : index
    %317 = memref.load %arg5[%c1_266, %c3_267] : memref<4x4xf32, #tpu.memory_space<smem>>
    %318 = arith.mulf %3, %317 : f32
    %c0_268 = arith.constant 0 : index
    %c1_269 = arith.constant 1 : index
    %c0_270 = arith.constant 0 : index
    %c0_271 = arith.constant 0 : index
    %319 = vector.load %arg7[%c0_268, %c1_269, %c0_270, %c0_271] : memref<1x4x2x128xf32, #tpu.memory_space<vmem>>, vector<1x1x2x128xf32>
    %320 = vector.shape_cast %319 : vector<1x1x2x128xf32> to vector<2x128xf32>
    %321 = vector.broadcast %318 : f32 to vector<2x128xf32>
    %322 = arith.mulf %321, %320 : vector<2x128xf32>
    %323 = arith.addf %316, %322 : vector<2x128xf32>
    %c1_272 = arith.constant 1 : index
    %c3_273 = arith.constant 3 : index
    %324 = memref.load %arg5[%c1_272, %c3_273] : memref<4x4xf32, #tpu.memory_space<smem>>
    %325 = arith.mulf %5, %324 : f32
    %c0_274 = arith.constant 0 : index
    %c1_275 = arith.constant 1 : index
    %c0_276 = arith.constant 0 : index
    %c0_277 = arith.constant 0 : index
    %326 = vector.load %arg8[%c0_274, %c1_275, %c0_276, %c0_277] : memref<1x4x2x128xf32, #tpu.memory_space<vmem>>, vector<1x1x2x128xf32>
    %327 = vector.shape_cast %326 : vector<1x1x2x128xf32> to vector<2x128xf32>
    %328 = vector.broadcast %325 : f32 to vector<2x128xf32>
    %329 = arith.mulf %328, %327 : vector<2x128xf32>
    %330 = arith.addf %323, %329 : vector<2x128xf32>
    %c2_278 = arith.constant 2 : index
    %c3_279 = arith.constant 3 : index
    %331 = memref.load %arg5[%c2_278, %c3_279] : memref<4x4xf32, #tpu.memory_space<smem>>
    %332 = arith.mulf %3, %331 : f32
    %c0_280 = arith.constant 0 : index
    %c2_281 = arith.constant 2 : index
    %c0_282 = arith.constant 0 : index
    %c0_283 = arith.constant 0 : index
    %333 = vector.load %arg7[%c0_280, %c2_281, %c0_282, %c0_283] : memref<1x4x2x128xf32, #tpu.memory_space<vmem>>, vector<1x1x2x128xf32>
    %334 = vector.shape_cast %333 : vector<1x1x2x128xf32> to vector<2x128xf32>
    %335 = vector.broadcast %332 : f32 to vector<2x128xf32>
    %336 = arith.mulf %335, %334 : vector<2x128xf32>
    %337 = arith.addf %330, %336 : vector<2x128xf32>
    %c2_284 = arith.constant 2 : index
    %c3_285 = arith.constant 3 : index
    %338 = memref.load %arg5[%c2_284, %c3_285] : memref<4x4xf32, #tpu.memory_space<smem>>
    %339 = arith.mulf %5, %338 : f32
    %c0_286 = arith.constant 0 : index
    %c2_287 = arith.constant 2 : index
    %c0_288 = arith.constant 0 : index
    %c0_289 = arith.constant 0 : index
    %340 = vector.load %arg8[%c0_286, %c2_287, %c0_288, %c0_289] : memref<1x4x2x128xf32, #tpu.memory_space<vmem>>, vector<1x1x2x128xf32>
    %341 = vector.shape_cast %340 : vector<1x1x2x128xf32> to vector<2x128xf32>
    %342 = vector.broadcast %339 : f32 to vector<2x128xf32>
    %343 = arith.mulf %342, %341 : vector<2x128xf32>
    %344 = arith.addf %337, %343 : vector<2x128xf32>
    %c3_290 = arith.constant 3 : index
    %c3_291 = arith.constant 3 : index
    %345 = memref.load %arg5[%c3_290, %c3_291] : memref<4x4xf32, #tpu.memory_space<smem>>
    %346 = arith.mulf %3, %345 : f32
    %c0_292 = arith.constant 0 : index
    %c3_293 = arith.constant 3 : index
    %c0_294 = arith.constant 0 : index
    %c0_295 = arith.constant 0 : index
    %347 = vector.load %arg7[%c0_292, %c3_293, %c0_294, %c0_295] : memref<1x4x2x128xf32, #tpu.memory_space<vmem>>, vector<1x1x2x128xf32>
    %348 = vector.shape_cast %347 : vector<1x1x2x128xf32> to vector<2x128xf32>
    %349 = vector.broadcast %346 : f32 to vector<2x128xf32>
    %350 = arith.mulf %349, %348 : vector<2x128xf32>
    %351 = arith.addf %344, %350 : vector<2x128xf32>
    %c3_296 = arith.constant 3 : index
    %c3_297 = arith.constant 3 : index
    %352 = memref.load %arg5[%c3_296, %c3_297] : memref<4x4xf32, #tpu.memory_space<smem>>
    %353 = arith.mulf %5, %352 : f32
    %c0_298 = arith.constant 0 : index
    %c3_299 = arith.constant 3 : index
    %c0_300 = arith.constant 0 : index
    %c0_301 = arith.constant 0 : index
    %354 = vector.load %arg8[%c0_298, %c3_299, %c0_300, %c0_301] : memref<1x4x2x128xf32, #tpu.memory_space<vmem>>, vector<1x1x2x128xf32>
    %355 = vector.shape_cast %354 : vector<1x1x2x128xf32> to vector<2x128xf32>
    %356 = vector.broadcast %353 : f32 to vector<2x128xf32>
    %357 = arith.mulf %356, %355 : vector<2x128xf32>
    %358 = arith.addf %351, %357 : vector<2x128xf32>
    %359 = arith.index_cast %arg0 : i32 to index
    %c3_302 = arith.constant 3 : index
    %360 = memref.load %arg3[%359, %c3_302] : memref<2x4xf32, #tpu.memory_space<smem>>
    %361 = vector.broadcast %360 : f32 to vector<2x128xf32>
    %362 = arith.addf %358, %361 : vector<2x128xf32>
    %c0_303 = arith.constant 0 : index
    %c3_304 = arith.constant 3 : index
    %c0_305 = arith.constant 0 : index
    %c0_306 = arith.constant 0 : index
    %363 = vector.load %arg9[%c0_303, %c3_304, %c0_305, %c0_306] : memref<1x4x2x128xf32, #tpu.memory_space<vmem>>, vector<1x1x2x128xf32>
    %364 = vector.shape_cast %363 : vector<1x1x2x128xf32> to vector<2x128xf32>
    %365 = vector.shape_cast %362 : vector<2x128xf32> to vector<1x1x2x128xf32>
    tpu.vector_store %arg9[%c0_303, %c3_304, %c0_305, %c0_306], %365 {strides = array<i32>} : memref<1x4x2x128xf32, #tpu.memory_space<vmem>>, vector<1x1x2x128xf32>,
    return
  }
  func.func @transform_0(%arg0: i32, %arg1: i32) -> (i32, i32) {
    %c0_i32 = arith.constant 0 : i32
    %c0_i32_0 = arith.constant 0 : i32
    %c0_i32_1 = arith.constant 0 : i32
    return %c0_i32, %c0_i32_0 : i32, i32
  }
  func.func @transform_1(%arg0: i32, %arg1: i32) -> (i32, i32) {
    %c0_i32 = arith.constant 0 : i32
    %c0_i32_0 = arith.constant 0 : i32
    %c0_i32_1 = arith.constant 0 : i32
    return %c0_i32, %c0_i32_0 : i32, i32
  }
  func.func @transform_2(%arg0: i32, %arg1: i32) -> (i32, i32) {
    %c0_i32 = arith.constant 0 : i32
    %c0_i32_0 = arith.constant 0 : i32
    %c0_i32_1 = arith.constant 0 : i32
    return %c0_i32, %c0_i32_0 : i32, i32
  }
  func.func @transform_3(%arg0: i32, %arg1: i32) -> (i32, i32) {
    %c0_i32 = arith.constant 0 : i32
    %c0_i32_0 = arith.constant 0 : i32
    %c0_i32_1 = arith.constant 0 : i32
    return %c0_i32, %c0_i32_0 : i32, i32
  }
  func.func @transform_4(%arg0: i32, %arg1: i32) -> (i32, i32, i32, i32) {
    %c0_i32 = arith.constant 0 : i32
    %c0_i32_0 = arith.constant 0 : i32
    %c0_i32_1 = arith.constant 0 : i32
    return %arg0, %c0_i32, %arg1, %c0_i32_0 : i32, i32, i32, i32
  }
  func.func @transform_5(%arg0: i32, %arg1: i32) -> (i32, i32, i32, i32) {
    %c0_i32 = arith.constant 0 : i32
    %c0_i32_0 = arith.constant 0 : i32
    %c0_i32_1 = arith.constant 0 : i32
    return %arg0, %c0_i32, %arg1, %c0_i32_0 : i32, i32, i32, i32
  }
  func.func @transform_6(%arg0: i32, %arg1: i32) -> (i32, i32, i32, i32) {
    %c0_i32 = arith.constant 0 : i32
    %c0_i32_0 = arith.constant 0 : i32
    %c0_i32_1 = arith.constant 0 : i32
    return %arg0, %c0_i32, %arg1, %c0_i32_0 : i32, i32, i32, i32
  }
  func.func @transform_7(%arg0: i32, %arg1: i32) -> (i32, i32, i32, i32) {
    %c0_i32 = arith.constant 0 : i32
    %c0_i32_0 = arith.constant 0 : i32
    %c0_i32_1 = arith.constant 0 : i32
    return %arg0, %c0_i32, %arg1, %c0_i32_0 : i32, i32, i32, i32
  }
}

</mosaic_0001>

<bundles_post_ra>
// kernel: tpu_custom_call.1
= control target key start
LH: loop header
LB: loop body
LE: loop exit
PB: predicated region body
PF: predicated region fallthrough
CT: control target
= control target key end

     0   :  { %s2016_s0 = inlined_call_operand.vmem [shape: f32[3,2], index: 0, kind: input, shape index: {}]   ;;  %s2017_s1 = inlined_call_operand.hbm [shape: f32[2,4], index: 1, kind: input, shape index: {}]   ;;  %s2018_s2 = inlined_call_operand.vmem [shape: f32[4,4], index: 2, kind: input, shape index: {}]   ;;  %s2019_s3 = inlined_call_operand.hbm [shape: f32[4,4], index: 3, kind: input, shape index: {}]   ;;  %s2020_s4 = inlined_call_operand.vmem [shape: f32[2,4,2,128], index: 4, kind: input, shape index: {}]   ;;  %s2021_s5 = inlined_call_operand.hbm [shape: f32[2,4,2,128], index: 5, kind: input, shape index: {}]   ;;  %s2022_s6 = inlined_call_operand.hbm [shape: f32[2,4,2,128], index: 6, kind: input, shape index: {}]   ;;  %s2023_s7 = inlined_call_operand.hbm [shape: f32[2,4,2,128], index: 7, kind: output, shape index: {}]  }
   0x1   :  { %2032 = sst [smem:[#allocation26_spill]] %s2016_s0 }
   0x2   :  { %2033 = sst [smem:[#allocation27_spill]] %s2017_s1 }
   0x3   :  { %2034 = sst [smem:[#allocation28_spill]] %s2018_s2 }
   0x4   :  { %2035 = sst [smem:[#allocation29_spill]] %s2019_s3 }
   0x5   :  { %2036 = sst [smem:[#allocation30_spill]] %s2020_s4 }
   0x6   :  { %2037 = sst [smem:[#allocation31_spill]] %s2021_s5 }
   0x7   :  { %2038 = sst [smem:[#allocation32_spill]] %s2022_s6 }
   0x8   :  { %12 = vsyncpa [#allocation6], 0 }
   0x9   :  { %13 = vsyncpa [#allocation5], 0 }
   0xa   :  { %14 = vsyncpa [#allocation9], 0 }
   0xb   :  { %15 = vsyncpa [#allocation11], 0 }
   0xc   :  { %16 = vsyncpa [#allocation3], 0 }
   0xd   :  { %18 = vsyncpa [#allocation3 + $0x1], 0 }
   0xe   :  { %19 = vsyncpa [#allocation14], 0 }
   0xf   :  { %21 = vsyncpa [#allocation14 + $0x1], 0 }
  0x10   :  { %22 = vsyncpa [#allocation4], 0 }
  0x11   :  { %24 = vsyncpa [#allocation4 + $0x1], 0  ;;  %s1429_s24 = smov 0   ;;  %s1431_s25 = smov 0  }
  0x12   :  { %s1433_s26 = smov 0   ;;  %s1435_s27 = smov 0  }
  0x13   :  { %s1437_s28 = smov 0   ;;  %s1439_s29 = smov 0  }
  0x14 LB: > { %2039 = sst [smem:[#allocation23_spill]] %s1372_s28  ;;  %s937_s30 = sadd.s32 4294967295, %s1376_s29   ;;  %s1376_s29 = sphi %s1439_s29, %s30_s29   ;;  %s1372_s28 = sphi %s1437_s28, %s2070_s28   ;;  %s1368_s27 = sphi %s1435_s27, %s2074_s27   ;;  %s1364_s26 = sphi %s1433_s26, %s2073_s26   ;;  %s1360_s25 = sphi %s1431_s25, %s2072_s25   ;;  %s1356_s24 = sphi %s1429_s24, %s2071_s24  }
  0x15   : > { %s938_s8 = sadd.s32 4294967294, %s1376_s29   ;;  %p176_p0 = scmp.ne.s32.totalorder %s1360_s25, %s1356_s24 }
  0x16   : > { %p1463_p1 = scmp.eq.s32.totalorder %s937_s30, 0  ;;  %p1467_p2 = scmp.eq.s32.totalorder %s937_s30, 1 }
  0x17   : > { %p236_p3 = scmp.eq.s32.totalorder %s938_s8, 1  ;;  %p939_p5 = scmp.ge.s32.totalorder %s1376_s29, 1 }
  0x18   : > { %s2040_s9 = scalar_select %p1463_p1, 1, 0 }
  0x19   : > { %p1473_p4 = por %p1463_p1, %p176_p0  ;;  %p1478_p6 = por %p236_p3, %p176_p0 }
  0x1a   : > { %p243_p7 = scmp.lt.s32.totalorder %s1376_s29, 3  ;;  %s2044_s0 = sld [smem:[#allocation26_spill]] }
  0x1b   : > { %s2042_s11 = scalar_select %p1473_p4, 1, 0 }
  0x1c   : > { %s2043_s12 = scalar_select %p1478_p6, 1, 0 }
  0x1d   : > { %p1486_p8 = pnand %p939_p5, %p243_p7  ;;  %s2046_s2 = sld [smem:[#allocation28_spill]] }
  0x1f   : > { %p1068_p10 = pneg %p1486_p8 }
  0x20   : > { %s256_s15 = sshll.u32 %s2044_s0, 4  ;;  %s257_s15 = int_to_ptr.vmem [resolvable:$true] %s256_s15 }
  0x21   : > { %p1498_p11 = pnand %p1068_p10, %p1463_p1  ;;  %s1158_s21 = scalar_lea.vmem %s257_s15, 64 }
  0x22   : > { %p1159_p12 = scmp.ne.s32.totalorder %s257_s15, %s1158_s21  ;;  %p1166_p5 = scmp.lt.s32.totalorder %s257_s15, %s257_s15 }
  0x23   : > { %s276_s19 = sshll.u32 %s2046_s2, 4  ;;  %p1160_p13 = pneg %p1498_p11  ;;  %s1502_s19 = int_to_ptr.vmem [resolvable:$true] %s276_s19 }
  0x24   : > { %p1167_p7 = scmp.lt.s32.totalorder %s1158_s21, %s1158_s21 }
  0x25   : > { %p1161_p0 = pnand %p1160_p13, %p1159_p12 }
  0x26   : > { %p1168_p9 = por %p1167_p7, %p1166_p5 }
  0x27   : > { %p1162_p3 = pneg %p1161_p0 }
  0x29   : > { %p1169_p6 = pnand %p1168_p9, %p1162_p3 }
  0x2b   : > { %1172 = shalt.err (!%p1169_p6)
}
  0x2c   : > { %s1378_s22 = smov [#allocation2]   ;;  %s2048_s1 = sld [smem:[#allocation27_spill]] }
  0x2d   : > { %1071 = dma.vmem_to_smem (!%p1498_p11), %s257_s15, 64, %s1378_s22, [#allocation6]  }
  0x32   : > { %s1173_s8 = scalar_lea.hbm %s2048_s1, 32 }
  0x33   : > { %p1174_p10 = scmp.ne.s32.totalorder %s2048_s1, %s1173_s8  ;;  %p1180_p6 = scmp.lt.u32.totalorder %s1173_s8, %s2048_s1 }
  0x35   : > { %p1176_p12 = pnand %p1174_p10, %p1160_p13 }
  0x37   : > { %p1177_p0 = pneg %p1176_p12 }
  0x39   : > { %p1182_p9 = pnand %p1180_p6, %p1177_p0 }
  0x3b   : > { %1185 = shalt.err (!%p1182_p9)
}
  0x3c   : > { %s1379_s21 = smov [#allocation7]   ;;  %s1186_s23 = scalar_lea.vmem %s1502_s19, 64 }
  0x3d   : > { %1074 = dma.hbm_to_smem (!%p1498_p11), %s2048_s1, 32, %s1379_s21, [#allocation5]  }
  0x3e   : > { %p1187_p3 = scmp.ne.s32.totalorder %s1502_s19, %s1186_s23  ;;  %p1194_p10 = scmp.lt.s32.totalorder %s1502_s19, %s1502_s19 }
  0x3f   : > { %p1195_p12 = scmp.lt.s32.totalorder %s1186_s23, %s1186_s23 }
  0x40   : > { %p1189_p5 = pnand %p1187_p3, %p1160_p13 }
  0x41   : > { %p1196_p0 = por %p1195_p12, %p1194_p10 }
  0x42   : > { %p1190_p7 = pneg %p1189_p5 }
  0x44   : > { %p1197_p6 = pnand %p1196_p0, %p1190_p7 }
  0x46   : > { %1200 = shalt.err (!%p1197_p6)
}
  0x47   : > { %s1380_s30 = smov [#allocation8]   ;;  %s2049_s3 = sld [smem:[#allocation29_spill]] }
  0x48   : > { %1077 = dma.vmem_to_smem (!%p1498_p11), %s1502_s19, 64, %s1380_s30, [#allocation9]  }
  0x4d   : > { %s1201_s14 = scalar_lea.hbm %s2049_s3, 64 }
  0x4e   : > { %p1202_p9 = scmp.ne.s32.totalorder %s2049_s3, %s1201_s14  ;;  %p1208_p7 = scmp.lt.u32.totalorder %s1201_s14, %s2049_s3 }
  0x50   : > { %p1204_p3 = pnand %p1202_p9, %p1160_p13 }
  0x52   : > { %p1205_p5 = pneg %p1204_p3 }
  0x54   : > { %p1210_p10 = pnand %p1208_p7, %p1205_p5 }
  0x56   : > { %1213 = shalt.err (!%p1210_p10)
}
  0x57   : > { %s1381_s22 = smov [#allocation10]   ;;  %s42_s30 = sadd.s32 1, %s1372_s28 }
  0x58   : > { %1080 = dma.hbm_to_smem (!%p1498_p11), %s2049_s3, 64, %s1381_s22, [#allocation11]  }
  0x59   : > { %s163_s8 = sadd.s32 1, %s1364_s26  ;;  %p44_p13 = scmp.ge.s32.totalorder %s42_s30, 2 }
  0x5a   : > { %p170_p12 = scmp.ne.s32.totalorder %s1364_s26, %s1360_s25  ;;  %p171_p0 = scmp.eq.s32.totalorder %s1376_s29, 0 }
  0x5b   : > { %p1096_p6 = scmp.lt.s32.totalorder %s1376_s29, 2  ;;  %s2076_s30 = smov (%p44_p13, %s42_s30), 0 }
  0x5c   : > { %2050 = sst [smem:[#allocation24_spill]] %s2076_s30  ;;  %p172_p9 = por %p171_p0, %p170_p12 }
  0x5d   : > { %p1565_p3 = por %p1467_p2, %p170_p12  ;;  %s158_s13 = ssub.s32 %s1372_s28, %s2076_s30 }
  0x5e   : > { %s1572_s14 = sand.u32 1, %s1364_s26   ;;  %p161_p11 = scmp.eq.s32.totalorder %s158_s13, 0 }
  0x5f   : > { %s2051_s20 = scalar_select %p1565_p3, 1, 0 }
  0x60   : > { %s2024_s17 = sshll.u32 %s1572_s14, 3  ;;  %s2025_s18 = sshll.u32 %s1372_s28, 7 }
  0x61   : > { %s1577_s21 = scalar_select %p161_p11, %s1364_s26, %s163_s8  }
  0x62   : > { %s2053_s5 = sld [smem:[#allocation31_spill]]  ;;  %s311_s19 = scalar_lea.vmem [#allocation12], %s2024_s17 }
  0x63   : > { %2052 = sst [smem:[#allocation25_spill]] %s1577_s21  ;;  %s319_s23 = sshll.u32 %s311_s19, 4  ;;  %s1594_s23 = int_to_ptr.vmem [resolvable:$true] %s319_s23 }
  0x64   : > { %p1590_p2 = pnand %p1096_p6, %p172_p9 }
  0x66   : > { %p1216_p7 = pneg %p1590_p2 }
  0x68   : > { %s1584_s10 = scalar_lea.hbm %s2053_s5, %s2025_s18  ;;  %s1219_s17 = scalar_lea.hbm %s2053_s5, 256 }
  0x69   : > { %s1214_s15 = scalar_lea.hbm %s1584_s10, 128  ;;  %p1220_p12 = scmp.lt.u32.totalorder %s1584_s10, %s2053_s5 }
  0x6a   : > { %p1215_p5 = scmp.ne.s32.totalorder %s1584_s10, %s1214_s15  ;;  %p1221_p0 = scmp.lt.u32.totalorder %s1219_s17, %s1214_s15 }
  0x6b   : > { %p1223_p9 = scmp.lt.u32.totalorder %s1214_s15, %s1584_s10 }
  0x6c   : > { %p1217_p10 = pnand %p1216_p7, %p1215_p5  ;;  %p1222_p6 = por %p1221_p0, %p1220_p12 }
  0x6e   : > { %p1218_p13 = pneg %p1217_p10  ;;  %p1224_p11 = por %p1223_p9, %p1222_p6 }
  0x70   : > { %p1225_p3 = pnand %p1224_p11, %p1218_p13 }
  0x72   : > { %1228 = shalt.err (!%p1225_p3)
}
  0x73   : > { %s1229_s8 = scalar_lea.vmem %s1594_s23, 128  ;;  %s1382_s22 = smov [#allocation12]  }
  0x74   : > { %p1230_p5 = scmp.ne.s32.totalorder %s1594_s23, %s1229_s8  ;;  %s1234_s19 = sshll.u32 %s1382_s22, 4  ;;  %s1235_s19 = int_to_ptr.vmem [resolvable:$false] %s1234_s19 }
  0x75   : > { %s1236_s0 = scalar_lea.vmem %s1235_s19, 256  ;;  %p1237_p1 = scmp.lt.s32.totalorder %s1594_s23, %s1235_s19 }
  0x76   : > { %p1232_p10 = pnand %p1230_p5, %p1216_p7  ;;  %p1238_p12 = scmp.lt.s32.totalorder %s1236_s0, %s1229_s8 }
  0x78   : > { %p1233_p4 = pneg %p1232_p10  ;;  %p1239_p0 = por %p1238_p12, %p1237_p1 }
  0x7a   : > { %p1240_p6 = pnand %p1239_p0, %p1233_p4 }
  0x7c   : > { %1243 = shalt.err (!%p1240_p6)
}
  0x7d   : > { %s1383_s17 = smov 32   ;;  %s1384_s18 = smov 2  }
  0x7e   : > { %s2055_s15 = scalar_lea.sflag [#allocation3], %s1572_s14  ;;  %s2056_s8 = sshll.u32 %s1372_s28, 7 }
  0x7f   : > { %1084 = dma.hbm_to_vmem [thread:$0]  (!%p1590_p2), %s1584_s10, 128, %s1594_s23, %s2055_s15, %s1383_s17, %s1383_s17, %s1384_s18  }
  0x80   : > { %s2057_s6 = sld [smem:[#allocation32_spill]]  ;;  %s2058_s1 = sshll.u32 %s1572_s14, 3 }
  0x81   : > { %s333_s2 = scalar_lea.vmem [#allocation13], %s2058_s1  ;;  %s330_s5 = scalar_lea.sflag [#allocation14], %s1572_s14 }
  0x82   : > { %s341_s3 = sshll.u32 %s333_s2, 4  ;;  %s1636_s3 = int_to_ptr.vmem [resolvable:$true] %s341_s3 }
  0x86   : > { %s1632_s0 = scalar_lea.hbm %s2057_s6, %s2056_s8  ;;  %s1249_s15 = scalar_lea.hbm %s2057_s6, 256 }
  0x87   : > { %s1244_s30 = scalar_lea.hbm %s1632_s0, 128  ;;  %p1250_p13 = scmp.lt.u32.totalorder %s1632_s0, %s2057_s6 }
  0x88   : > { %p1245_p1 = scmp.ne.s32.totalorder %s1632_s0, %s1244_s30  ;;  %p1251_p9 = scmp.lt.u32.totalorder %s1249_s15, %s1244_s30 }
  0x89   : > { %p1253_p5 = scmp.lt.u32.totalorder %s1244_s30, %s1632_s0 }
  0x8a   : > { %p1247_p4 = pnand %p1245_p1, %p1216_p7  ;;  %p1252_p11 = por %p1251_p9, %p1250_p13 }
  0x8c   : > { %p1248_p3 = pneg %p1247_p4  ;;  %p1254_p10 = por %p1253_p5, %p1252_p11 }
  0x8e   : > { %p1255_p12 = pnand %p1254_p10, %p1248_p3 }
  0x90   : > { %1258 = shalt.err (!%p1255_p12)
}
  0x91   : > { %s1259_s1 = scalar_lea.vmem %s1636_s3, 128  ;;  %s1385_s2 = smov [#allocation13]  }
  0x92   : > { %p1260_p0 = scmp.ne.s32.totalorder %s1636_s3, %s1259_s1  ;;  %s1264_s19 = sshll.u32 %s1385_s2, 4  ;;  %s1265_s19 = int_to_ptr.vmem [resolvable:$false] %s1264_s19 }
  0x93   : > { %s1266_s10 = scalar_lea.vmem %s1265_s19, 256  ;;  %p1267_p4 = scmp.lt.s32.totalorder %s1636_s3, %s1265_s19 }
  0x94   : > { %p1262_p6 = pnand %p1260_p0, %p1216_p7  ;;  %p1268_p13 = scmp.lt.s32.totalorder %s1266_s10, %s1259_s1 }
  0x96   : > { %p1263_p1 = pneg %p1262_p6  ;;  %p1269_p9 = por %p1268_p13, %p1267_p4 }
  0x98   : > { %p1270_p11 = pnand %p1269_p9, %p1263_p1 }
  0x9a   : > { %1273 = shalt.err (!%p1270_p11)
}
  0x9b   : > { %1087 = dma.hbm_to_vmem [thread:$0]  (!%p1590_p2), %s1632_s0, 128, %s1636_s3, %s330_s5, %s1383_s17, %s1383_s17, %s1384_s18  }
  0x9c   : > { %353 = sbr.rel (%p1486_p8) target bundleno = 272 (0x110), region = 48  ;;  %p2059_p7 = scmp.ne.s32.totalorder (!%p1486_p8), %s2040_s9, 0 }
  0xa3   : > { %1327 = dma.done.wait (%p2059_p7), [#allocation6], 64  }
  0xa4   : > { %1329 = vsyncadd (%p2059_p7), [#allocation6], 4294967232 }
  0xa5   : > { %1331 = dma.done.wait (%p2059_p7), [#allocation5], 32  }
  0xa6   : > { %1333 = vsyncadd (%p2059_p7), [#allocation5], 4294967264 }
  0xa7   : > { %1335 = dma.done.wait (%p2059_p7), [#allocation9], 64  }
  0xa8   : > { %1337 = vsyncadd (%p2059_p7), [#allocation9], 4294967232 }
  0xa9   : > { %1339 = dma.done.wait (%p2059_p7), [#allocation11], 64  }
  0xaa   : > { %1341 = vsyncadd (%p2059_p7), [#allocation11], 4294967232  ;;  %s1686_s3 = sand.u32 1, %s1360_s25   ;;  %p2060_p8 = scmp.ne.s32.totalorder %s2042_s11, 0 }
  0xab   : > { %s1689_s5 = sshll.u32 %s1686_s3, 3  ;;  %s372_s16 = scalar_lea.sflag [#allocation3], %s1686_s3 }
  0xac   : > { %s1693_s30 = scalar_lea.vmem [#allocation12], %s1689_s5 }
  0xad   : > { %1343 = dma.done.wait (%p2060_p8), %s372_s16, 128  }
  0xae   : > { %1345 = vsyncadd (%p2060_p8), %s372_s16, 4294967168  ;;  %s381_s9 = scalar_lea.sflag [#allocation14], %s1686_s3  ;;  %s1701_s14 = scalar_lea.vmem [#allocation13], %s1689_s5 }
  0xaf   : > { %1347 = dma.done.wait (%p2060_p8), %s381_s9, 128  }
  0xb0   : > { %1349 = vsyncadd (%p2060_p8), %s381_s9, 4294967168 }
  0xb1   : > { %389 = sfence }
  0xb2   : > { %p429_p2 = scmp.lt.s32.totalorder %s1368_s27, 1  ;;  %s438_s13 = sshra.s32 %s1368_s27, 7  ;;  %v478_v11 = vld [vmem:[%s1693_s30] sm:$0x3]  ;;  %v483_v15 = vld [vmem:[%s1701_s14] sm:$0x3] }
  0xb3   : > { %s1041_s18 = sshll.u32 %s438_s13, 7  ;;  %s443_s0 = sand.u32 127, %s1368_s27  ;;  %v970_v19 = vld [vmem:[%s1693_s30 + $0x2] sm:$0x3]  ;;  %v971_v23 = vld [vmem:[%s1701_s14 + $0x2] sm:$0x3] }
  0xb4   : > { %s430_s17 = scalar_select %p429_p2, %s1368_s27, 1  ;;  %v973_v27 = vld [vmem:[%s1693_s30 + $0x4] sm:$0x3]  ;;  %v974_v33 = vld [vmem:[%s1701_s14 + $0x4] sm:$0x3] }
  0xb5   : > { %s1042_s15 = sadd.s32 128, %s1041_s18  ;;  %s1712_s8 = sld [smem:[#allocation2 + %s1368_s27]]  ;;  %v976_v42 = vld [vmem:[%s1693_s30 + $0x6] sm:$0x3]  ;;  %v556_v49 = vld [vmem:[%s1693_s30] sm:$0x3] }
  0xb6   : > { %s1040_s23 = sshll.u32 %s430_s17, 3  ;;  %s444_s22 = sadd.s32 %s1042_s15, %s443_s0  ;;  %v977_v55 = vld [vmem:[%s1701_s14 + $0x6] sm:$0x3]  ;;  %v561_v57 = vld [vmem:[%s1701_s14] sm:$0x3] }
  0xb7   : > { %s2061_s4 = sld [smem:[#allocation30_spill]]  ;;  %s1044_s19 = sadd.s32 256, %s1041_s18  ;;  %v988_v62 = vld [vmem:[%s1693_s30 + $0x2] sm:$0x3] }
  0xb8   : > { %s448_s10 = sadd.s32 %s1044_s19, %s443_s0  ;;  %s450_s16 = sld [smem:[#allocation8]] }
  0xb9   : > { %s1719_s9 = sld [smem:[#allocation2 + %s444_s22]]  ;;  %s1772_s21 = sshll.u32 %s1368_s27, 7 }
  0xba   : > { %s963_s13 = sld [smem:[#allocation8 + $0x80]]  ;;  %p2065_p5 = scmp.ne.s32.totalorder %s2051_s20, 0 }
  0xbb   : > { %s965_s17 = sld [smem:[#allocation8 + $0x100]] }
  0xbc   : > { %s967_s6 = sld [smem:[#allocation8 + $0x180]] }
  0xbd   : > { %s1717_s2 = scalar_lea.vmem %s2061_s4, %s1040_s23  ;;  %s1721_s15 = sld [smem:[#allocation2 + %s448_s10]] }
  0xbe   : > { %s1723_s28 = sld [smem:[#allocation10]]  ;;  %s451_s18 = smul.f32 %s450_s16, %s1712_s8  ;;  %v452_v0 = vld [vmem:[%s1717_s2] sm:$0x3]  ;;  %v964_v1 = vld [vmem:[%s1717_s2 + $0x2] sm:$0x3] }
  0xbf   : > { %s1725_s23 = sld [smem:[#allocation10 + $0x80]]  ;;  %v966_v3 = vld [vmem:[%s1717_s2 + $0x4] sm:$0x3]  ;;  %v968_v6 = vld [vmem:[%s1717_s2 + $0x6] sm:$0x3]  ;;  %s1741_s16 = sld [smem:[#allocation8 + $0x1]] }
  0xc0   : > { %s1729_s0 = sld [smem:[#allocation10 + $0x100]]  ;;  %s456_s11 = smul.f32 %s963_s13, %s1712_s8  ;;  %v453_v2 = vstv %s451_s18  ;;  %v533_v29 = vld [vmem:[%s1717_s2] sm:$0x3]  ;;  %v981_v30 = vld [vmem:[%s1717_s2 + $0x2] sm:$0x3] }
  0xc1   : > { %s463_s22 = smul.f32 %s965_s17, %s1712_s8  ;;  %s1735_s1 = sld [smem:[#allocation10 + $0x180]]  ;;  %v454_v4 = vmul.f32 %v453_v2, %v452_v0  ;;  %v983_v36 = vld [vmem:[%s1717_s2 + $0x4] sm:$0x3]  ;;  %v985_v40 = vld [vmem:[%s1717_s2 + $0x6] sm:$0x3] }
  0xc2   : > { %v459_v5 = vstv %s456_s11  ;;  %s470_s19 = smul.f32 %s967_s6, %s1712_s8  ;;  %s1746_s17 = sld [smem:[#allocation8 + $0x81]] }
  0xc3   : > { %v460_v7 = vmul.f32 %v964_v1, %v459_v5  ;;  %v466_v8 = vstv %s463_s22  ;;  %s1750_s18 = sld [smem:[#allocation8 + $0x101]]  ;;  %v989_v5 = vld [vmem:[%s1701_s14 + $0x2] sm:$0x3] }
  0xc4   : > { %s477_s10 = smul.f32 %s1723_s28, %s1719_s9  ;;  %v467_v9 = vmul.f32 %v966_v3, %v466_v8  ;;  %v473_v10 = vstv %s470_s19  ;;  %s1759_s19 = sld [smem:[#allocation10 + $0x1]] }
  0xc5   : > { %s482_s13 = smul.f32 %s1723_s28, %s1721_s15  ;;  %v461_v12 = vadd.f32 %v460_v7, %v454_v4  ;;  %v474_v13 = vmul.f32 %v968_v6, %v473_v10  ;;  %s1755_s28 = sld [smem:[#allocation8 + $0x181]]  ;;  %v991_v7 = vld [vmem:[%s1693_s30 + $0x4] sm:$0x3] }
  0xc6   : > { %v479_v14 = vstv %s477_s10  ;;  %s488_s6 = smul.f32 %s1725_s23, %s1719_s9 }
  0xc7   : > { %v484_v16 = vstv %s482_s13  ;;  %s494_s11 = smul.f32 %s1725_s23, %s1721_s15  ;;  %v468_v17 = vadd.f32 %v467_v9, %v461_v12  ;;  %v480_v18 = vmul.f32 %v479_v14, %v478_v11  ;;  %s1766_s13 = sld [smem:[#allocation10 + $0x81]]  ;;  %v992_v11 = vld [vmem:[%s1701_s14 + $0x4] sm:$0x3] }
  0xc8   : > { %s501_s22 = smul.f32 %s1729_s0, %s1719_s9  ;;  %v491_v20 = vstv %s488_s6  ;;  %v485_v22 = vmul.f32 %v484_v16, %v483_v15  ;;  %s1778_s6 = sld [smem:[#allocation10 + $0x101]]  ;;  %v999_v15 = vld [vmem:[%s1717_s2 + $0x2] sm:$0x3] }
  0xc9   : > { %s507_s10 = smul.f32 %s1729_s0, %s1721_s15  ;;  %v475_v21 = vadd.f32 %v474_v13, %v468_v17  ;;  %v497_v24 = vstv %s494_s11  ;;  %v492_v26 = vmul.f32 %v970_v19, %v491_v20  ;;  %s1790_s11 = sld [smem:[#allocation7 + %s1772_s21]]  ;;  %v606_v13 = vld [vmem:[%s1717_s2] sm:$0x3]  ;;  %v1001_v20 = vld [vmem:[%s1717_s2 + $0x4] sm:$0x3] }
  0xca   : > { %s520_s4 = smul.f32 %s1735_s1, %s1721_s15  ;;  %v504_v28 = vstv %s501_s22  ;;  %v498_v32 = vmul.f32 %v971_v23, %v497_v24 }
  0xcb   : > { %v481_v25 = vadd.f32 %v480_v18, %v475_v21  ;;  %s532_s0 = smul.f32 %s1741_s16, %s1712_s8  ;;  %v510_v34 = vstv %s507_s10  ;;  %s1787_s16 = sld [smem:[#allocation10 + $0x181]]  ;;  %v505_v37 = vmul.f32 %v973_v27, %v504_v28  ;;  %v994_v28 = vld [vmem:[%s1693_s30 + $0x6] sm:$0x3] }
  0xcc   : > { %s537_s23 = smul.f32 %s1746_s17, %s1712_s8  ;;  %s1801_s10 = sld [smem:[#allocation8 + $0x2]]  ;;  %v511_v46 = vmul.f32 %v974_v33, %v510_v34  ;;  %v523_v56 = vstv %s520_s4 }
  0xcd   : > { %v486_v31 = vadd.f32 %v485_v22, %v481_v25  ;;  %v534_v35 = vstv %s532_s0  ;;  %s543_s27 = smul.f32 %s1750_s18, %s1712_s8  ;;  %v524_v1 = vmul.f32 %v977_v55, %v523_v56  ;;  %v1003_v25 = vld [vmem:[%s1717_s2 + $0x6] sm:$0x3] }
  0xce   : > { %v535_v38 = vmul.f32 %v534_v35, %v533_v29  ;;  %v539_v39 = vstv %s537_s23  ;;  %s549_s17 = smul.f32 %s1755_s28, %s1712_s8  ;;  %s1806_s23 = sld [smem:[#allocation8 + $0x82]]  ;;  %v629_v35 = vld [vmem:[%s1693_s30] sm:$0x3] }
  0xcf   : > { %v493_v41 = vadd.f32 %v492_v26, %v486_v31  ;;  %s2062_s22 = smul.f32 %s1735_s1, %s1719_s9  ;;  %v540_v44 = vmul.f32 %v981_v30, %v539_v39  ;;  %v545_v45 = vstv %s543_s27  ;;  %s1810_s27 = sld [smem:[#allocation8 + $0x102]]  ;;  %v528_v14 = vstv %s1790_s11 }
  0xd0   : > { %s555_s18 = smul.f32 %s1759_s19, %s1719_s9  ;;  %v546_v47 = vmul.f32 %v983_v36, %v545_v45  ;;  %v551_v48 = vstv %s549_s17  ;;  %s1819_s17 = sld [smem:[#allocation8 + $0x182]] }
  0xd1   : > { %v517_v43 = vstv %s2062_s22  ;;  %s560_s28 = smul.f32 %s1759_s19, %s1721_s15  ;;  %v499_v50 = vadd.f32 %v498_v32, %v493_v41  ;;  %v541_v51 = vadd.f32 %v540_v44, %v535_v38  ;;  %v552_v52 = vmul.f32 %v985_v40, %v551_v48  ;;  %s1824_s1 = sld [smem:[#allocation10 + $0x2]]  ;;  %v634_v41 = vld [vmem:[%s1701_s14] sm:$0x3]  ;;  %v1006_v48 = vld [vmem:[%s1693_s30 + $0x2] sm:$0x3] }
  0xd2   : > { %v557_v53 = vstv %s555_s18  ;;  %s566_s0 = smul.f32 %s1766_s13, %s1719_s9  ;;  %v518_v54 = vmul.f32 %v976_v42, %v517_v43  ;;  %s1830_s18 = sld [smem:[#allocation10 + $0x82]] }
  0xd3   : > { %v562_v58 = vstv %s560_s28  ;;  %s571_s19 = smul.f32 %s1766_s13, %s1721_s15  ;;  %v506_v59 = vadd.f32 %v505_v37, %v499_v50  ;;  %v547_v60 = vadd.f32 %v546_v47, %v541_v51  ;;  %v558_v61 = vmul.f32 %v557_v53, %v556_v49  ;;  %s598_s28 = sadd.s32 1, %s1772_s21  ;;  %v995_v37 = vld [vmem:[%s1701_s14 + $0x6] sm:$0x3]  ;;  %v1007_v53 = vld [vmem:[%s1701_s14 + $0x2] sm:$0x3] }
  0xd4   : > { %v568_v63 = vstv %s566_s0  ;;  %s577_s22 = smul.f32 %s1778_s6, %s1719_s9  ;;  %v563_v3 = vmul.f32 %v562_v58, %v561_v57  ;;  %s1841_s13 = sld [smem:[#allocation10 + $0x102]]  ;;  %v1009_v58 = vld [vmem:[%s1693_s30 + $0x4] sm:$0x3] }
  0xd5   : > { %s582_s4 = smul.f32 %s1778_s6, %s1721_s15  ;;  %v512_v0 = vadd.f32 %v511_v46, %v506_v59  ;;  %v553_v2 = vadd.f32 %v552_v52, %v547_v60  ;;  %v569_v4 = vmul.f32 %v988_v62, %v568_v63  ;;  %v573_v6 = vstv %s571_s19  ;;  %s1852_s11 = sld [smem:[#allocation7 + %s598_s28]]  ;;  %v679_v60 = vld [vmem:[%s1717_s2] sm:$0x3]  ;;  %v1017_v63 = vld [vmem:[%s1717_s2 + $0x2] sm:$0x3] }
  0xd6   : > { %s593_s6 = smul.f32 %s1787_s16, %s1721_s15  ;;  %v579_v10 = vstv %s577_s22  ;;  %v574_v18 = vmul.f32 %v989_v5, %v573_v6  ;;  %v1019_v5 = vld [vmem:[%s1717_s2 + $0x4] sm:$0x3] }
  0xd7   : > { %v519_v8 = vadd.f32 %v518_v54, %v512_v0  ;;  %v559_v9 = vadd.f32 %v558_v61, %v553_v2  ;;  %v584_v12 = vstv %s582_s4  ;;  %s605_s0 = smul.f32 %s1801_s10, %s1712_s8  ;;  %s1850_s10 = sld [smem:[#allocation10 + $0x182]]  ;;  %v580_v21 = vmul.f32 %v991_v7, %v579_v10  ;;  %v1010_v2 = vld [vmem:[%s1701_s14 + $0x4] sm:$0x3] }
  0xd8   : > { %s610_s19 = smul.f32 %s1806_s23, %s1712_s8  ;;  %v585_v22 = vmul.f32 %v992_v11, %v584_v12  ;;  %s1860_s4 = sld [smem:[#allocation8 + $0x3]]  ;;  %v595_v32 = vstv %s593_s6 }
  0xd9   : > { %v525_v16 = vadd.f32 %v524_v1, %v519_v8  ;;  %v564_v17 = vadd.f32 %v563_v3, %v559_v9  ;;  %v607_v19 = vstv %s605_s0  ;;  %s616_s22 = smul.f32 %s1810_s27, %s1712_s8  ;;  %s1871_s0 = sld [smem:[#allocation8 + $0x83]]  ;;  %v596_v47 = vmul.f32 %v995_v37, %v595_v32  ;;  %v1021_v9 = vld [vmem:[%s1717_s2 + $0x6] sm:$0x3]  ;;  %v1024_v32 = vld [vmem:[%s1693_s30 + $0x2] sm:$0x3] }
  0xda   : > { %v608_v23 = vmul.f32 %v607_v19, %v606_v13  ;;  %v612_v24 = vstv %s610_s19  ;;  %s622_s23 = smul.f32 %s1819_s17, %s1712_s8  ;;  %s1874_s19 = scalar_lea.vmem [#allocation15], %s1689_s5  ;;  %v702_v19 = vld [vmem:[%s1693_s30] sm:$0x3] }
  0xdb   : > { %v529_v26 = vadd.f32 %v528_v14, %v525_v16  ;;  %v570_v27 = vadd.f32 %v569_v4, %v564_v17  ;;  %v613_v29 = vmul.f32 %v999_v15, %v612_v24  ;;  %v618_v30 = vstv %s616_s22  ;;  %s628_s27 = smul.f32 %s1824_s1, %s1719_s9  ;;  %s1880_s6 = sld [smem:[#allocation8 + $0x103]]  ;;  %v1012_v15 = vld [vmem:[%s1693_s30 + $0x6] sm:$0x3]  ;;  %v1013_v24 = vld [vmem:[%s1701_s14 + $0x6] sm:$0x3] }
  0xdc   : > { %s2063_s28 = smul.f32 %s1787_s16, %s1719_s9  ;;  %v619_v33 = vmul.f32 %v1001_v20, %v618_v30  ;;  %v624_v34 = vstv %s622_s23  ;;  %s1889_s23 = sld [smem:[#allocation10 + $0x3]]  ;;  %v600_v61 = vstv %s1852_s11 }
  0xdd   : > { %s633_s17 = smul.f32 %s1824_s1, %s1721_s15  ;;  %530 = vst [vmem:[%s1874_s19] sm:$0x3] %v529_v26  ;;  %v575_v36 = vadd.f32 %v574_v18, %v570_v27  ;;  %v614_v38 = vadd.f32 %v613_v29, %v608_v23  ;;  %v625_v39 = vmul.f32 %v1003_v25, %v624_v34  ;;  %v630_v40 = vstv %s628_s27  ;;  %s1885_s1 = sld [smem:[#allocation8 + $0x183]]  ;;  %v707_v26 = vld [vmem:[%s1701_s14] sm:$0x3] }
  0xde   : > { %v590_v31 = vstv %s2063_s28  ;;  %s639_s16 = smul.f32 %s1830_s18, %s1719_s9  ;;  %v631_v46 = vmul.f32 %v630_v40, %v629_v35  ;;  %s1897_s28 = sld [smem:[#allocation10 + $0x83]] }
  0xdf   : > { %v635_v42 = vstv %s633_s17  ;;  %s644_s5 = smul.f32 %s1830_s18, %s1721_s15  ;;  %v581_v43 = vadd.f32 %v580_v21, %v575_v36  ;;  %v591_v44 = vmul.f32 %v994_v28, %v590_v31  ;;  %v620_v45 = vadd.f32 %v619_v33, %v614_v38  ;;  %s1910_s17 = sld [smem:[#allocation10 + $0x103]]  ;;  %v1025_v38 = vld [vmem:[%s1701_s14 + $0x2] sm:$0x3] }
  0xe0   : > { %s650_s22 = smul.f32 %s1841_s13, %s1719_s9  ;;  %v641_v49 = vstv %s639_s16  ;;  %v636_v52 = vmul.f32 %v635_v42, %v634_v41  ;;  %s1930_s2 = sld [smem:[#allocation10 + $0x183]] }
  0xe1   : > { %s655_s18 = smul.f32 %s1841_s13, %s1721_s15  ;;  %v586_v50 = vadd.f32 %v585_v22, %v581_v43  ;;  %v626_v51 = vadd.f32 %v625_v39, %v620_v45  ;;  %v646_v54 = vstv %s644_s5  ;;  %v642_v57 = vmul.f32 %v1006_v48, %v641_v49  ;;  %s671_s13 = sadd.s32 2, %s1772_s21  ;;  %v1028_v49 = vld [vmem:[%s1701_s14 + $0x4] sm:$0x3] }
  0xe2   : > { %s661_s27 = smul.f32 %s1850_s10, %s1719_s9  ;;  %v652_v59 = vstv %s650_s22  ;;  %v647_v62 = vmul.f32 %v1007_v53, %v646_v54  ;;  %v1030_v54 = vld [vmem:[%s1693_s30 + $0x6] sm:$0x3] }
  0xe3   : > { %v592_v55 = vadd.f32 %v591_v44, %v586_v50  ;;  %v632_v56 = vadd.f32 %v631_v46, %v626_v51  ;;  %s678_s16 = smul.f32 %s1860_s4, %s1712_s8  ;;  %v657_v3 = vstv %s655_s18  ;;  %v653_v6 = vmul.f32 %v1009_v58, %v652_v59  ;;  %v1027_v44 = vld [vmem:[%s1693_s30 + $0x4] sm:$0x3]  ;;  %v1031_v58 = vld [vmem:[%s1701_s14 + $0x6] sm:$0x3]  ;;  %s1964_s30 = scalar_lea.hbm %s2023_s7, %s1772_s21 }
  0xe4   : > { %s683_s5 = smul.f32 %s1871_s0, %s1712_s8  ;;  %s1919_s0 = sld [smem:[#allocation7 + %s671_s13]]  ;;  %v658_v14 = vmul.f32 %v1010_v2, %v657_v3  ;;  %v663_v16 = vstv %s661_s27 }
  0xe5   : > { %v597_v0 = vadd.f32 %v596_v47, %v592_v55  ;;  %v637_v1 = vadd.f32 %v636_v52, %v632_v56  ;;  %v680_v4 = vstv %s678_s16  ;;  %s689_s4 = smul.f32 %s1880_s6, %s1712_s8  ;;  %v664_v29 = vmul.f32 %v1012_v15, %v663_v16  ;;  %s751_s14 = scalar_lea.sflag [#allocation4], %s1686_s3 }
  0xe6   : > { %v681_v7 = vmul.f32 %v680_v4, %v679_v60  ;;  %v685_v8 = vstv %s683_s5  ;;  %s695_s11 = smul.f32 %s1885_s1, %s1712_s8 }
  0xe7   : > { %v601_v10 = vadd.f32 %v600_v61, %v597_v0  ;;  %v643_v11 = vadd.f32 %v642_v57, %v637_v1  ;;  %v686_v12 = vmul.f32 %v1017_v63, %v685_v8  ;;  %v691_v13 = vstv %s689_s4  ;;  %s701_s6 = smul.f32 %s1889_s23, %s1719_s9  ;;  %s1386_s4 = smov [#allocation15]  }
  0xe8   : > { %v692_v17 = vmul.f32 %v1019_v5, %v691_v13  ;;  %v697_v18 = vstv %s695_s11  ;;  %s706_s8 = smul.f32 %s1889_s23, %s1721_s15  ;;  %s1278_s11 = sshll.u32 %s1386_s4, 4  ;;  %s1279_s11 = int_to_ptr.vmem [resolvable:$false] %s1278_s11 }
  0xe9   : > { %996 = vst [vmem:[%s1874_s19 + $0x2] sm:$0x3] %v601_v10  ;;  %v648_v20 = vadd.f32 %v647_v62, %v643_v11  ;;  %v687_v21 = vadd.f32 %v686_v12, %v681_v7  ;;  %v698_v22 = vmul.f32 %v1021_v9, %v697_v18  ;;  %v703_v23 = vstv %s701_s6  ;;  %s712_s1 = smul.f32 %s1897_s28, %s1719_s9 }
  0xea   : > { %s2064_s22 = smul.f32 %s1850_s10, %s1721_s15  ;;  %v708_v27 = vstv %s706_s8  ;;  %v704_v31 = vmul.f32 %v703_v23, %v702_v19  ;;  %v673_v43 = vstv %s1919_s0  ;;  %s1280_s0 = scalar_lea.vmem %s1279_s11, 256 }
  0xeb   : > { %s717_s23 = smul.f32 %s1897_s28, %s1721_s15  ;;  %v654_v28 = vadd.f32 %v653_v6, %v648_v20  ;;  %v693_v30 = vadd.f32 %v692_v17, %v687_v21  ;;  %v714_v33 = vstv %s712_s1  ;;  %v709_v37 = vmul.f32 %v708_v27, %v707_v26  ;;  %s744_s28 = sadd.s32 3, %s1772_s21 }
  0xec   : > { %v668_v25 = vstv %s2064_s22  ;;  %s723_s18 = smul.f32 %s1910_s17, %s1719_s9  ;;  %v715_v42 = vmul.f32 %v1024_v32, %v714_v33 }
  0xed   : > { %v659_v34 = vadd.f32 %v658_v14, %v654_v28  ;;  %v669_v35 = vmul.f32 %v1013_v24, %v668_v25  ;;  %v699_v36 = vadd.f32 %v698_v22, %v693_v30  ;;  %v719_v39 = vstv %s717_s23  ;;  %s728_s10 = smul.f32 %s1910_s17, %s1721_s15  ;;  %s745_s17 = sld [smem:[#allocation7 + %s744_s28]] }
  0xee   : > { %v725_v45 = vstv %s723_s18  ;;  %s734_s27 = smul.f32 %s1930_s2, %s1719_s9  ;;  %v720_v48 = vmul.f32 %v1025_v38, %v719_v39  ;;  %s765_s9 = sshll.u32 %s1874_s19, 4  ;;  %s1966_s9 = int_to_ptr.vmem [resolvable:$true] %s765_s9 }
  0xef   : > { %v665_v40 = vadd.f32 %v664_v29, %v659_v34  ;;  %v705_v41 = vadd.f32 %v704_v31, %v699_v36  ;;  %v730_v50 = vstv %s728_s10  ;;  %s739_s13 = smul.f32 %s1930_s2, %s1721_s15  ;;  %v726_v53 = vmul.f32 %v1027_v44, %v725_v45  ;;  %s1274_s5 = scalar_lea.vmem %s1966_s9, 128 }
  0xf0   : > { %v736_v55 = vstv %s734_s27  ;;  %v731_v57 = vmul.f32 %v1028_v49, %v730_v50  ;;  %p1275_p3 = scmp.ne.s32.totalorder %s1966_s9, %s1274_s5  ;;  %p1281_p0 = scmp.lt.s32.totalorder %s1966_s9, %s1279_s11 }
  0xf1   : > { %v670_v46 = vadd.f32 %v669_v35, %v665_v40  ;;  %v710_v47 = vadd.f32 %v709_v37, %v705_v41  ;;  %v741_v59 = vstv %s739_s13  ;;  %v737_v61 = vmul.f32 %v1030_v54, %v736_v55  ;;  %p1282_p6 = scmp.lt.s32.totalorder %s1280_s0, %s1274_s5 }
  0xf2   : > { %v742_v63 = vmul.f32 %v1031_v58, %v741_v59  ;;  %p1276_p10 = pnand %p1275_p3, %p2065_p5 }
  0xf3   : > { %v674_v51 = vadd.f32 %v673_v43, %v670_v46  ;;  %v716_v52 = vadd.f32 %v715_v42, %v710_v47  ;;  %v746_v1 = vstv %s745_s17  ;;  %p1283_p1 = por %p1282_p6, %p1281_p0 }
  0xf4   : > { %p1277_p12 = pneg %p1276_p10 }
  0xf5   : > { %1014 = vst [vmem:[%s1874_s19 + $0x4] sm:$0x3] %v674_v51  ;;  %v721_v56 = vadd.f32 %v720_v48, %v716_v52 }
  0xf6   : > { %p1284_p4 = pnand %p1283_p1, %p1277_p12 }
  0xf7   : > { %v727_v60 = vadd.f32 %v726_v53, %v721_v56 }
  0xf9   : > { %v732_v62 = vadd.f32 %v731_v57, %v727_v60 }
  0xfb   : > { %v738_v0 = vadd.f32 %v737_v61, %v732_v62 }
  0xfd   : > { %v743_v2 = vadd.f32 %v742_v63, %v738_v0 }
  0xff   : > { %v747_v3 = vadd.f32 %v746_v1, %v743_v2 }
 0x101   : > { %1032 = vst [vmem:[%s1874_s19 + $0x6] sm:$0x3] %v747_v3 }
 0x102   : > { %1287 = shalt.err (!%p1284_p4)
}
 0x103   : > { %s1288_s21 = scalar_lea.hbm %s1964_s30, 128  ;;  %s1292_s8 = scalar_lea.hbm %s2023_s7, 256 }
 0x104   : > { %p1289_p13 = scmp.ne.s32.totalorder %s1964_s30, %s1288_s21  ;;  %p1293_p7 = scmp.lt.u32.totalorder %s1964_s30, %s2023_s7 }
 0x105   : > { %p1294_p8 = scmp.lt.u32.totalorder %s1292_s8, %s1288_s21  ;;  %p1296_p3 = scmp.lt.u32.totalorder %s1288_s21, %s1964_s30 }
 0x106   : > { %p1290_p9 = pnand %p1289_p13, %p2065_p5 }
 0x107   : > { %p1295_p2 = por %p1294_p8, %p1293_p7 }
 0x108   : > { %p1291_p11 = pneg %p1290_p9 }
 0x109   : > { %p1297_p10 = por %p1296_p3, %p1295_p2 }
 0x10b   : > { %p1298_p12 = pnand %p1297_p10, %p1291_p11 }
 0x10d   : > { %1301 = shalt.err (!%p1298_p12)
}
 0x10e   : > { %s1387_s22 = smov 32   ;;  %s1388_s23 = smov 2  }
 0x10f   : > { %1066 = dma.vmem_to_hbm [thread:$0]  (%p2065_p5), %s1966_s9, 128, %s1964_s30, %s751_s14, %s1387_s22, %s1387_s22, %s1388_s23  }
 0x110 PF: > { %s780_s18 = sand.u32 1, %s1356_s24   ;;  %p2066_p0 = scmp.ne.s32.totalorder %s2043_s12, 0 }
 0x111   : > { %p2067_p6 = scmp.ge.s32.totalorder %s1376_s29, 2  ;;  %s781_s10 = scalar_lea.sflag [#allocation4], %s780_s18 }
 0x113   : > { %p1089_p1 = pnand %p2067_p6, %p2066_p0 }
 0x115   : > { %1351 = dma.done.wait (!%p1089_p1), %s781_s10, 128  }
 0x116   : > { %1353 = vsyncadd (!%p1089_p1), %s781_s10, 4294967168  ;;  %s30_s29 = sadd.s32 1, %s1376_s29   ;;  %s2068_s27 = sld [smem:[#allocation25_spill]] }
 0x117   : > { %p27_p4 = scmp.ge.s32.totalorder %s30_s29, 4   ;;  %s2069_s20 = sld [smem:[#allocation23_spill]] }
 0x118   : > { %s2070_s28 = sld [smem:[#allocation24_spill]]  ;;  %s2071_s24 = smov %s1360_s25 }
 0x119   : > { %s2072_s25 = smov %s1364_s26  ;;  %29 = sbr.rel (!%p27_p4) target bundleno = 20 (0x14), region = 139 }
 0x11c   : > { %s2073_s26 = smov %s2068_s27 }
 0x11d   : > { %s2074_s27 = smov %s2069_s20 }
 0x120   :  { %786 = vsyncpa [#allocation3], 1 }
 0x121   :  { %788 = vsyncpa [#allocation3 + $0x1], 1 }
 0x122   :  { %789 = vsyncpa [#allocation14], 1 }
 0x123   :  { %791 = vsyncpa [#allocation14 + $0x1], 1 }
 0x124   :  { %792 = vsyncpa [#allocation4], 1 }
 0x125   :  { %794 = vsyncpa [#allocation4 + $0x1], 1 }
 0x126   :  { %795 = vsyncpa [#allocation5], 1 }
 0x127   :  { %797 = vsyncpa [#allocation5 + $0x1], 1 }
 0x128   :  { %798 = vsyncpa [#allocation11], 1 }
 0x129   :  { %799 = vsyncpa [#allocation6], 1 }
 0x12a   :  { %801 = vsyncpa [#allocation6 + $0x1], 1 }
 0x12b   :  { %802 = vsyncpa [#allocation9], 1 }

</bundles_post_ra>
